<compile_context>
chip_gen: v5e
topology: v5e:2x2
jax: 0.10.0
libtpu: 0.0.40
codegen_flags: <defaults>
</compile_context>

<pallas_src>
import functools
import math

import jax
import jax.numpy as jnp
from jax import lax
from jax.experimental import pallas as pl
from jax.experimental.pallas import tpu as pltpu

# float32 = exact PyTorch parity; switch to jnp.bfloat16 on v6e/v7x at real sizes.
MM_DTYPE = jnp.float32


def _fused_encoder_kernel(
    x_ref,                   # (B, S, D)   whole batch
    wqkv_ref, bqkv_ref,      # (L, D, 3D), (L, 1, 3D)
    wo_ref, bo_ref,          # (L, H, dh, D), (L, 1, D)
    w1_ref, b1_ref,          # (L, D, FF), (L, 1, FF)
    w2_ref, b2_ref,          # (L, FF, D), (L, 1, D)
    g1_ref, be1_ref,         # (L, 1, D), (L, 1, D)
    g2_ref, be2_ref,         # (L, 1, D), (L, 1, D)
    o_ref,                   # (B, S, D)
    *,
    num_heads: int,
    num_layers: int,
):
    eps = 1e-5
    B, S, D = x_ref.shape
    H = num_heads
    dh = D // H
    scale = 1.0 / math.sqrt(dh)

    # Batch-flattened token slab: (B*S, D).  Leading-dim merge => no relayout.
    xf = x_ref[...].astype(jnp.float32).reshape(B * S, D)

    for l in range(num_layers):                 # static unroll: both layers fused
        # ---- fused QKV projection: one (B*S, D) @ (D, 3D) matmul ------------
        qkv = jnp.dot(xf.astype(MM_DTYPE), wqkv_ref[l].astype(MM_DTYPE),
                      preferred_element_type=jnp.float32) + bqkv_ref[l]   # (B*S, 3D)

        # ---- (B*H, S, dh) head-major stacks (batch folded into head axis) ---
        def split_heads(base):
            return jnp.concatenate(
                [qkv[b * S:(b + 1) * S,
                     base + h * dh: base + (h + 1) * dh][None]
                 for b in range(B) for h in range(H)],
                axis=0)                          # (B*H, S, dh)
        q = split_heads(0)
        k = split_heads(D)
        v = split_heads(2 * D)

        # ---- scaled-dot-product attention, all (batch, head) pairs at once --
        scores = jnp.einsum('gqd,gkd->gqk', q.astype(MM_DTYPE), k.astype(MM_DTYPE),
                            preferred_element_type=jnp.float32) * scale   # (B*H, S, S)
        scores = scores - jnp.max(scores, axis=-1, keepdims=True)
        p = jnp.exp(scores)
        p = p * pl.reciprocal(jnp.sum(p, axis=-1, keepdims=True), approx=True)
        ctx = jnp.einsum('gqk,gkd->gqd', p.astype(MM_DTYPE), v.astype(MM_DTYPE),
                         preferred_element_type=jnp.float32)              # (B*H, S, dh)

        # ---- output projection: head-batched matmul + reduce over heads -----
        # (equivalent to concat-heads @ Wo^T, but with no transpose/lane concat)
        attn_rows = []
        for b in range(B):                       # static; leading-axis slices only
            proj = jnp.einsum('hqd,hde->hqe',
                              ctx[b * H:(b + 1) * H].astype(MM_DTYPE),
                              wo_ref[l].astype(MM_DTYPE),
                              preferred_element_type=jnp.float32)         # (H, S, D)
            attn_rows.append(jnp.sum(proj, axis=0))                       # (S, D)
        attn = jnp.concatenate(attn_rows, axis=0) + bo_ref[l]             # (B*S, D)

        # ---- residual + LayerNorm1 (dropout = identity in eval mode) --------
        x1 = xf + attn
        mu1 = jnp.mean(x1, axis=-1, keepdims=True)
        var1 = jnp.mean((x1 - mu1) ** 2, axis=-1, keepdims=True)
        x1 = (x1 - mu1) * lax.rsqrt(var1 + eps) * g1_ref[l] + be1_ref[l]

        # ---- feed-forward (ReLU) ---------------------------------------------
        hdn = jnp.maximum(
            jnp.dot(x1.astype(MM_DTYPE), w1_ref[l].astype(MM_DTYPE),
                    preferred_element_type=jnp.float32) + b1_ref[l],
            0.0)
        ff = jnp.dot(hdn.astype(MM_DTYPE), w2_ref[l].astype(MM_DTYPE),
                     preferred_element_type=jnp.float32) + b2_ref[l]

        # ---- residual + LayerNorm2 ---------------------------------------------
        x2 = x1 + ff
        mu2 = jnp.mean(x2, axis=-1, keepdims=True)
        var2 = jnp.mean((x2 - mu2) ** 2, axis=-1, keepdims=True)
        xf = (x2 - mu2) * lax.rsqrt(var2 + eps) * g2_ref[l] + be2_ref[l]

    o_ref[...] = xf.reshape(B, S, D).astype(o_ref.dtype)


def transformer_encoder_only(x, params, num_heads):
    """Full TransformerEncoderOnly forward in a single pallas_call / grid step.

    x: (B, S, D) float32. params: dict of per-layer-stacked weights (leading dim = L).
    """
    B, S, D = x.shape
    L = params["wqkv_t"].shape[0]

    def replicated(arr):
        zeros = (0,) * arr.ndim
        return pl.BlockSpec(arr.shape, lambda i, _z=zeros: _z)

    weight_order = ["wqkv_t", "bqkv", "wo_hr", "bo", "w1_t", "b1",
                    "w2_t", "b2", "ln1_g", "ln1_b", "ln2_g", "ln2_b"]
    weights = [params[k] for k in weight_order]

    in_specs = [pl.BlockSpec((B, S, D), lambda i: (0, 0, 0))] + [
        replicated(w) for w in weights
    ]

    kernel = functools.partial(_fused_encoder_kernel,
                               num_heads=num_heads, num_layers=L)

    return pl.pallas_call(
        kernel,
        out_shape=jax.ShapeDtypeStruct((B, S, D), x.dtype),
        grid_spec=pltpu.PrefetchScalarGridSpec(
            num_scalar_prefetch=0,
            grid=(1,),                            # single step: launch-bound shapes
            in_specs=in_specs,
            out_specs=pl.BlockSpec((B, S, D), lambda i: (0, 0, 0)),
        ),
        compiler_params=pltpu.CompilerParams(dimension_semantics=("arbitrary",)),
    )(x, *weights)


def init_params(key, d_model, num_heads, num_layers, dim_feedforward):
    """Deterministic synthetic parameters, packed/stacked for the fused kernel.

    Follows PyTorch conventions (x @ W^T, in_proj packed [q;k;v], per-head split
    along columns), pre-transposed / pre-reshaped on the host.
    """
    dh = d_model // num_heads
    per_layer = []
    for k in jax.random.split(key, num_layers):
        ks = jax.random.split(k, 10)
        s = 0.05
        wq = s * jax.random.normal(ks[0], (d_model, d_model), jnp.float32)
        wk = s * jax.random.normal(ks[1], (d_model, d_model), jnp.float32)
        wv = s * jax.random.normal(ks[2], (d_model, d_model), jnp.float32)
        wo = s * jax.random.normal(ks[3], (d_model, d_model), jnp.float32)
        w1 = s * jax.random.normal(ks[4], (dim_feedforward, d_model), jnp.float32)
        w2 = s * jax.random.normal(ks[5], (d_model, dim_feedforward), jnp.float32)
        bq = 0.01 * jax.random.normal(ks[6], (d_model,), jnp.float32)
        bk = 0.01 * jax.random.normal(ks[7], (d_model,), jnp.float32)
        bv = 0.01 * jax.random.normal(ks[8], (d_model,), jnp.float32)
        rest = 0.01 * jax.random.normal(ks[9], (3, max(d_model, dim_feedforward)),
                                        jnp.float32)
        per_layer.append(dict(
            wqkv_t=jnp.concatenate([wq.T, wk.T, wv.T], axis=1),           # (D, 3D)
            bqkv=jnp.concatenate([bq, bk, bv])[None, :],                  # (1, 3D)
            wo_hr=wo.T.reshape(num_heads, dh, d_model),                   # (H, dh, D)
            bo=rest[0, :d_model][None, :],                                # (1, D)
            w1_t=w1.T, b1=rest[1, :dim_feedforward][None, :],             # (D, FF), (1, FF)
            w2_t=w2.T, b2=rest[2, :d_model][None, :],                     # (FF, D), (1, D)
            ln1_g=jnp.ones((1, d_model), jnp.float32),
            ln1_b=jnp.zeros((1, d_model), jnp.float32),
            ln2_g=jnp.ones((1, d_model), jnp.float32),
            ln2_b=jnp.zeros((1, d_model), jnp.float32),
        ))
    # Stack every parameter along a leading layer axis of size num_layers.
    return {name: jnp.stack([p[name] for p in per_layer], axis=0)
            for name in per_layer[0]}


if __name__ == "__main__":
    # TODO(synk): dropout is eval-mode identity; training-mode RNG dropout not implemented.
    B, S, D = 2, 8, 32              # batch, sequence, input_dim (d_model)
    num_heads = 4
    num_layers = 2
    dim_feedforward = 128

    key = jax.random.PRNGKey(0)
    kx, kp = jax.random.split(key)
    x = jax.random.normal(kx, (B, S, D), jnp.float32)

    params = init_params(kp, D, num_heads, num_layers, dim_feedforward)

    out = transformer_encoder_only(x, params, num_heads)
    out = jax.block_until_ready(out)
    assert out.shape == (B, S, D) and out.dtype == jnp.float32
    assert bool(jnp.all(jnp.isfinite(out)))
    print("KERNEL_OK")
</pallas_src>

<mosaic_0001>
module attributes {stable_mosaic.version = 11 : i64} {
  func.func @_fused_encoder_kernel(%arg0: i32, %arg1: memref<2x8x32xf32, #tpu.memory_space<vmem>>, %arg2: memref<2x32x96xf32, #tpu.memory_space<vmem>>, %arg3: memref<2x1x96xf32, #tpu.memory_space<vmem>>, %arg4: memref<2x4x8x32xf32, #tpu.memory_space<vmem>>, %arg5: memref<2x1x32xf32, #tpu.memory_space<vmem>>, %arg6: memref<2x32x128xf32, #tpu.memory_space<vmem>>, %arg7: memref<2x1x128xf32, #tpu.memory_space<vmem>>, %arg8: memref<2x128x32xf32, #tpu.memory_space<vmem>>, %arg9: memref<2x1x32xf32, #tpu.memory_space<vmem>>, %arg10: memref<2x1x32xf32, #tpu.memory_space<vmem>>, %arg11: memref<2x1x32xf32, #tpu.memory_space<vmem>>, %arg12: memref<2x1x32xf32, #tpu.memory_space<vmem>>, %arg13: memref<2x1x32xf32, #tpu.memory_space<vmem>>, %arg14: memref<2x8x32xf32, #tpu.memory_space<vmem>>) attributes {dimension_semantics = [#tpu.dimension_semantics<arbitrary>], iteration_bounds = array<i64: 1>, scalar_prefetch = 0 : i64, scratch_operands = 0 : i64, tpu.core_type = #tpu.core_type<tc>, window_params = [{pipeline_mode = #tpu.pipeline_mode<synchronous>, transform_indices = @transform_0, window_bounds = array<i64: 2, 8, 32>}, {pipeline_mode = #tpu.pipeline_mode<synchronous>, transform_indices = @transform_1, window_bounds = array<i64: 2, 32, 96>}, {pipeline_mode = #tpu.pipeline_mode<synchronous>, transform_indices = @transform_2, window_bounds = array<i64: 2, 1, 96>}, {pipeline_mode = #tpu.pipeline_mode<synchronous>, transform_indices = @transform_3, window_bounds = array<i64: 2, 4, 8, 32>}, {pipeline_mode = #tpu.pipeline_mode<synchronous>, transform_indices = @transform_4, window_bounds = array<i64: 2, 1, 32>}, {pipeline_mode = #tpu.pipeline_mode<synchronous>, transform_indices = @transform_5, window_bounds = array<i64: 2, 32, 128>}, {pipeline_mode = #tpu.pipeline_mode<synchronous>, transform_indices = @transform_6, window_bounds = array<i64: 2, 1, 128>}, {pipeline_mode = #tpu.pipeline_mode<synchronous>, transform_indices = @transform_7, window_bounds = array<i64: 2, 128, 32>}, {pipeline_mode = #tpu.pipeline_mode<synchronous>, transform_indices = @transform_8, window_bounds = array<i64: 2, 1, 32>}, {pipeline_mode = #tpu.pipeline_mode<synchronous>, transform_indices = @transform_9, window_bounds = array<i64: 2, 1, 32>}, {pipeline_mode = #tpu.pipeline_mode<synchronous>, transform_indices = @transform_10, window_bounds = array<i64: 2, 1, 32>}, {pipeline_mode = #tpu.pipeline_mode<synchronous>, transform_indices = @transform_11, window_bounds = array<i64: 2, 1, 32>}, {pipeline_mode = #tpu.pipeline_mode<synchronous>, transform_indices = @transform_12, window_bounds = array<i64: 2, 1, 32>}, {pipeline_mode = #tpu.pipeline_mode<synchronous>, transform_indices = @transform_13, window_bounds = array<i64: 2, 8, 32>}]} {
    %c0 = arith.constant 0 : index
    %c0_0 = arith.constant 0 : index
    %c0_1 = arith.constant 0 : index
    %0 = vector.load %arg1[%c0, %c0_0, %c0_1] : memref<2x8x32xf32, #tpu.memory_space<vmem>>, vector<2x8x32xf32>
    %1 = vector.shape_cast %0 : vector<2x8x32xf32> to vector<16x32xf32>
    %c0_2 = arith.constant 0 : index
    %c0_3 = arith.constant 0 : index
    %c0_4 = arith.constant 0 : index
    %2 = vector.load %arg2[%c0_2, %c0_3, %c0_4] : memref<2x32x96xf32, #tpu.memory_space<vmem>>, vector<1x32x96xf32>
    %3 = vector.shape_cast %2 : vector<1x32x96xf32> to vector<32x96xf32>
    %cst = arith.constant dense<0.000000e+00> : vector<16x96xf32>
    %4 = tpu.matmul %1, %3, %cst {dimension_numbers = #tpu.dot_dimension_numbers<[1], [0], [0], [1], [0, 0, 1, 1], [], []>} : vector<16x32xf32>, vector<32x96xf32>, vector<16x96xf32> -> vector<16x96xf32>
    %c0_5 = arith.constant 0 : index
    %c0_6 = arith.constant 0 : index
    %c0_7 = arith.constant 0 : index
    %5 = vector.load %arg3[%c0_5, %c0_6, %c0_7] : memref<2x1x96xf32, #tpu.memory_space<vmem>>, vector<1x1x96xf32>
    %6 = vector.shape_cast %5 : vector<1x1x96xf32> to vector<1x96xf32>
    %7 = vector.broadcast %6 : vector<1x96xf32> to vector<16x96xf32>
    %8 = arith.addf %4, %7 : vector<16x96xf32>
    %9 = vector.extract_strided_slice %8 {offsets = [0, 0], sizes = [8, 8], strides = [1, 1]} : vector<16x96xf32> to vector<8x8xf32>
    %10 = vector.shape_cast %9 : vector<8x8xf32> to vector<1x8x8xf32>
    %11 = vector.extract_strided_slice %8 {offsets = [0, 8], sizes = [8, 8], strides = [1, 1]} : vector<16x96xf32> to vector<8x8xf32>
    %12 = vector.shape_cast %11 : vector<8x8xf32> to vector<1x8x8xf32>
    %13 = vector.extract_strided_slice %8 {offsets = [0, 16], sizes = [8, 8], strides = [1, 1]} : vector<16x96xf32> to vector<8x8xf32>
    %14 = vector.shape_cast %13 : vector<8x8xf32> to vector<1x8x8xf32>
    %15 = vector.extract_strided_slice %8 {offsets = [0, 24], sizes = [8, 8], strides = [1, 1]} : vector<16x96xf32> to vector<8x8xf32>
    %16 = vector.shape_cast %15 : vector<8x8xf32> to vector<1x8x8xf32>
    %17 = vector.extract_strided_slice %8 {offsets = [8, 0], sizes = [8, 8], strides = [1, 1]} : vector<16x96xf32> to vector<8x8xf32>
    %18 = vector.shape_cast %17 : vector<8x8xf32> to vector<1x8x8xf32>
    %19 = vector.extract_strided_slice %8 {offsets = [8, 8], sizes = [8, 8], strides = [1, 1]} : vector<16x96xf32> to vector<8x8xf32>
    %20 = vector.shape_cast %19 : vector<8x8xf32> to vector<1x8x8xf32>
    %21 = vector.extract_strided_slice %8 {offsets = [8, 16], sizes = [8, 8], strides = [1, 1]} : vector<16x96xf32> to vector<8x8xf32>
    %22 = vector.shape_cast %21 : vector<8x8xf32> to vector<1x8x8xf32>
    %23 = vector.extract_strided_slice %8 {offsets = [8, 24], sizes = [8, 8], strides = [1, 1]} : vector<16x96xf32> to vector<8x8xf32>
    %24 = vector.shape_cast %23 : vector<8x8xf32> to vector<1x8x8xf32>
    %25 = tpu.concatenate %10, %12, %14, %16, %18, %20, %22, %24 in 0 : vector<1x8x8xf32>, vector<1x8x8xf32>, vector<1x8x8xf32>, vector<1x8x8xf32>, vector<1x8x8xf32>, vector<1x8x8xf32>, vector<1x8x8xf32>, vector<1x8x8xf32> -> vector<8x8x8xf32>
    %26 = vector.extract_strided_slice %8 {offsets = [0, 32], sizes = [8, 8], strides = [1, 1]} : vector<16x96xf32> to vector<8x8xf32>
    %27 = vector.shape_cast %26 : vector<8x8xf32> to vector<1x8x8xf32>
    %28 = vector.extract_strided_slice %8 {offsets = [0, 40], sizes = [8, 8], strides = [1, 1]} : vector<16x96xf32> to vector<8x8xf32>
    %29 = vector.shape_cast %28 : vector<8x8xf32> to vector<1x8x8xf32>
    %30 = vector.extract_strided_slice %8 {offsets = [0, 48], sizes = [8, 8], strides = [1, 1]} : vector<16x96xf32> to vector<8x8xf32>
    %31 = vector.shape_cast %30 : vector<8x8xf32> to vector<1x8x8xf32>
    %32 = vector.extract_strided_slice %8 {offsets = [0, 56], sizes = [8, 8], strides = [1, 1]} : vector<16x96xf32> to vector<8x8xf32>
    %33 = vector.shape_cast %32 : vector<8x8xf32> to vector<1x8x8xf32>
    %34 = vector.extract_strided_slice %8 {offsets = [8, 32], sizes = [8, 8], strides = [1, 1]} : vector<16x96xf32> to vector<8x8xf32>
    %35 = vector.shape_cast %34 : vector<8x8xf32> to vector<1x8x8xf32>
    %36 = vector.extract_strided_slice %8 {offsets = [8, 40], sizes = [8, 8], strides = [1, 1]} : vector<16x96xf32> to vector<8x8xf32>
    %37 = vector.shape_cast %36 : vector<8x8xf32> to vector<1x8x8xf32>
    %38 = vector.extract_strided_slice %8 {offsets = [8, 48], sizes = [8, 8], strides = [1, 1]} : vector<16x96xf32> to vector<8x8xf32>
    %39 = vector.shape_cast %38 : vector<8x8xf32> to vector<1x8x8xf32>
    %40 = vector.extract_strided_slice %8 {offsets = [8, 56], sizes = [8, 8], strides = [1, 1]} : vector<16x96xf32> to vector<8x8xf32>
    %41 = vector.shape_cast %40 : vector<8x8xf32> to vector<1x8x8xf32>
    %42 = tpu.concatenate %27, %29, %31, %33, %35, %37, %39, %41 in 0 : vector<1x8x8xf32>, vector<1x8x8xf32>, vector<1x8x8xf32>, vector<1x8x8xf32>, vector<1x8x8xf32>, vector<1x8x8xf32>, vector<1x8x8xf32>, vector<1x8x8xf32> -> vector<8x8x8xf32>
    %43 = vector.extract_strided_slice %8 {offsets = [0, 64], sizes = [8, 8], strides = [1, 1]} : vector<16x96xf32> to vector<8x8xf32>
    %44 = vector.shape_cast %43 : vector<8x8xf32> to vector<1x8x8xf32>
    %45 = vector.extract_strided_slice %8 {offsets = [0, 72], sizes = [8, 8], strides = [1, 1]} : vector<16x96xf32> to vector<8x8xf32>
    %46 = vector.shape_cast %45 : vector<8x8xf32> to vector<1x8x8xf32>
    %47 = vector.extract_strided_slice %8 {offsets = [0, 80], sizes = [8, 8], strides = [1, 1]} : vector<16x96xf32> to vector<8x8xf32>
    %48 = vector.shape_cast %47 : vector<8x8xf32> to vector<1x8x8xf32>
    %49 = vector.extract_strided_slice %8 {offsets = [0, 88], sizes = [8, 8], strides = [1, 1]} : vector<16x96xf32> to vector<8x8xf32>
    %50 = vector.shape_cast %49 : vector<8x8xf32> to vector<1x8x8xf32>
    %51 = vector.extract_strided_slice %8 {offsets = [8, 64], sizes = [8, 8], strides = [1, 1]} : vector<16x96xf32> to vector<8x8xf32>
    %52 = vector.shape_cast %51 : vector<8x8xf32> to vector<1x8x8xf32>
    %53 = vector.extract_strided_slice %8 {offsets = [8, 72], sizes = [8, 8], strides = [1, 1]} : vector<16x96xf32> to vector<8x8xf32>
    %54 = vector.shape_cast %53 : vector<8x8xf32> to vector<1x8x8xf32>
    %55 = vector.extract_strided_slice %8 {offsets = [8, 80], sizes = [8, 8], strides = [1, 1]} : vector<16x96xf32> to vector<8x8xf32>
    %56 = vector.shape_cast %55 : vector<8x8xf32> to vector<1x8x8xf32>
    %57 = vector.extract_strided_slice %8 {offsets = [8, 88], sizes = [8, 8], strides = [1, 1]} : vector<16x96xf32> to vector<8x8xf32>
    %58 = vector.shape_cast %57 : vector<8x8xf32> to vector<1x8x8xf32>
    %59 = tpu.concatenate %44, %46, %48, %50, %52, %54, %56, %58 in 0 : vector<1x8x8xf32>, vector<1x8x8xf32>, vector<1x8x8xf32>, vector<1x8x8xf32>, vector<1x8x8xf32>, vector<1x8x8xf32>, vector<1x8x8xf32>, vector<1x8x8xf32> -> vector<8x8x8xf32>
    "tpu.trace_start"() <{level = 10 : i32, message = "gqd,gkd->gqk"}> : () -> ()
    %cst_8 = arith.constant dense<0.000000e+00> : vector<8x8x8xf32>
    %60 = tpu.matmul %25, %42, %cst_8 {dimension_numbers = #tpu.dot_dimension_numbers<[2], [2], [1], [1], [0, 0, 0, 1, 1, 1], [0], [0]>} : vector<8x8x8xf32>, vector<8x8x8xf32>, vector<8x8x8xf32> -> vector<8x8x8xf32>
    "tpu.trace_stop"() : () -> ()
    %cst_9 = arith.constant 0.353553385 : f32
    %61 = vector.broadcast %cst_9 : f32 to vector<8x8x8xf32>
    %62 = arith.mulf %60, %61 : vector<8x8x8xf32>
    %cst_10 = arith.constant dense<0xFF800000> : vector<8x8xf32>
    %63 = vector.multi_reduction <maximumf>, %62, %cst_10 [2] : vector<8x8x8xf32> to vector<8x8xf32>
    %64 = vector.shape_cast %63 : vector<8x8xf32> to vector<8x8x1xf32>
    %65 = vector.broadcast %64 : vector<8x8x1xf32> to vector<8x8x8xf32>
    %66 = arith.subf %62, %65 : vector<8x8x8xf32>
    %67 = math.exp %66 : vector<8x8x8xf32>
    %cst_11 = arith.constant dense<0.000000e+00> : vector<8x8xf32>
    %68 = vector.multi_reduction <add>, %67, %cst_11 [2] : vector<8x8x8xf32> to vector<8x8xf32>
    %69 = vector.shape_cast %68 : vector<8x8xf32> to vector<8x8x1xf32>
    %70 = tpu.reciprocal %69 {approx = true} : vector<8x8x1xf32> -> vector<8x8x1xf32>
    %71 = vector.broadcast %70 : vector<8x8x1xf32> to vector<8x8x8xf32>
    %72 = arith.mulf %67, %71 : vector<8x8x8xf32>
    "tpu.trace_start"() <{level = 10 : i32, message = "gqk,gkd->gqd"}> : () -> ()
    %cst_12 = arith.constant dense<0.000000e+00> : vector<8x8x8xf32>
    %73 = tpu.matmul %72, %59, %cst_12 {dimension_numbers = #tpu.dot_dimension_numbers<[2], [1], [1], [2], [0, 0, 0, 1, 1, 2], [0], [0]>} : vector<8x8x8xf32>, vector<8x8x8xf32>, vector<8x8x8xf32> -> vector<8x8x8xf32>
    "tpu.trace_stop"() : () -> ()
    %74 = vector.extract_strided_slice %73 {offsets = [0, 0, 0], sizes = [4, 8, 8], strides = [1, 1, 1]} : vector<8x8x8xf32> to vector<4x8x8xf32>
    %c0_13 = arith.constant 0 : index
    %c0_14 = arith.constant 0 : index
    %c0_15 = arith.constant 0 : index
    %c0_16 = arith.constant 0 : index
    %75 = vector.load %arg4[%c0_13, %c0_14, %c0_15, %c0_16] : memref<2x4x8x32xf32, #tpu.memory_space<vmem>>, vector<1x4x8x32xf32>
    %76 = vector.shape_cast %75 : vector<1x4x8x32xf32> to vector<4x8x32xf32>
    "tpu.trace_start"() <{level = 10 : i32, message = "hqd,hde->hqe"}> : () -> ()
    %cst_17 = arith.constant dense<0.000000e+00> : vector<4x8x32xf32>
    %77 = tpu.matmul %74, %76, %cst_17 {dimension_numbers = #tpu.dot_dimension_numbers<[2], [1], [1], [2], [0, 0, 0, 1, 1, 2], [0], [0]>} : vector<4x8x8xf32>, vector<4x8x32xf32>, vector<4x8x32xf32> -> vector<4x8x32xf32>
    "tpu.trace_stop"() : () -> ()
    %cst_18 = arith.constant dense<0.000000e+00> : vector<8x32xf32>
    %78 = vector.multi_reduction <add>, %77, %cst_18 [0] : vector<4x8x32xf32> to vector<8x32xf32>
    %79 = vector.extract_strided_slice %73 {offsets = [4, 0, 0], sizes = [4, 8, 8], strides = [1, 1, 1]} : vector<8x8x8xf32> to vector<4x8x8xf32>
    %c0_19 = arith.constant 0 : index
    %c0_20 = arith.constant 0 : index
    %c0_21 = arith.constant 0 : index
    %c0_22 = arith.constant 0 : index
    %80 = vector.load %arg4[%c0_19, %c0_20, %c0_21, %c0_22] : memref<2x4x8x32xf32, #tpu.memory_space<vmem>>, vector<1x4x8x32xf32>
    %81 = vector.shape_cast %80 : vector<1x4x8x32xf32> to vector<4x8x32xf32>
    "tpu.trace_start"() <{level = 10 : i32, message = "hqd,hde->hqe"}> : () -> ()
    %cst_23 = arith.constant dense<0.000000e+00> : vector<4x8x32xf32>
    %82 = tpu.matmul %79, %81, %cst_23 {dimension_numbers = #tpu.dot_dimension_numbers<[2], [1], [1], [2], [0, 0, 0, 1, 1, 2], [0], [0]>} : vector<4x8x8xf32>, vector<4x8x32xf32>, vector<4x8x32xf32> -> vector<4x8x32xf32>
    "tpu.trace_stop"() : () -> ()
    %cst_24 = arith.constant dense<0.000000e+00> : vector<8x32xf32>
    %83 = vector.multi_reduction <add>, %82, %cst_24 [0] : vector<4x8x32xf32> to vector<8x32xf32>
    %84 = tpu.concatenate %78, %83 in 0 : vector<8x32xf32>, vector<8x32xf32> -> vector<16x32xf32>
    %c0_25 = arith.constant 0 : index
    %c0_26 = arith.constant 0 : index
    %c0_27 = arith.constant 0 : index
    %85 = vector.load %arg5[%c0_25, %c0_26, %c0_27] : memref<2x1x32xf32, #tpu.memory_space<vmem>>, vector<1x1x32xf32>
    %86 = vector.shape_cast %85 : vector<1x1x32xf32> to vector<1x32xf32>
    %87 = vector.broadcast %86 : vector<1x32xf32> to vector<16x32xf32>
    %88 = arith.addf %84, %87 : vector<16x32xf32>
    %89 = arith.addf %1, %88 : vector<16x32xf32>
    %cst_28 = arith.constant dense<0.000000e+00> : vector<16xf32>
    %90 = vector.multi_reduction <add>, %89, %cst_28 [1] : vector<16x32xf32> to vector<16xf32>
    %91 = vector.shape_cast %90 : vector<16xf32> to vector<16x1xf32>
    %cst_29 = arith.constant 3.200000e+01 : f32
    %92 = vector.broadcast %cst_29 : f32 to vector<16x1xf32>
    %93 = arith.divf %91, %92 : vector<16x1xf32>
    %94 = vector.broadcast %93 : vector<16x1xf32> to vector<16x32xf32>
    %95 = arith.subf %89, %94 : vector<16x32xf32>
    %96 = arith.mulf %95, %95 : vector<16x32xf32>
    %cst_30 = arith.constant dense<0.000000e+00> : vector<16xf32>
    %97 = vector.multi_reduction <add>, %96, %cst_30 [1] : vector<16x32xf32> to vector<16xf32>
    %98 = vector.shape_cast %97 : vector<16xf32> to vector<16x1xf32>
    %cst_31 = arith.constant 3.200000e+01 : f32
    %99 = vector.broadcast %cst_31 : f32 to vector<16x1xf32>
    %100 = arith.divf %98, %99 : vector<16x1xf32>
    %101 = vector.broadcast %93 : vector<16x1xf32> to vector<16x32xf32>
    %102 = arith.subf %89, %101 : vector<16x32xf32>
    %cst_32 = arith.constant 9.99999974E-6 : f32
    %103 = vector.broadcast %cst_32 : f32 to vector<16x1xf32>
    %104 = arith.addf %100, %103 : vector<16x1xf32>
    %105 = math.rsqrt %104 : vector<16x1xf32>
    %106 = vector.broadcast %105 : vector<16x1xf32> to vector<16x32xf32>
    %107 = arith.mulf %102, %106 : vector<16x32xf32>
    %c0_33 = arith.constant 0 : index
    %c0_34 = arith.constant 0 : index
    %c0_35 = arith.constant 0 : index
    %108 = vector.load %arg10[%c0_33, %c0_34, %c0_35] : memref<2x1x32xf32, #tpu.memory_space<vmem>>, vector<1x1x32xf32>
    %109 = vector.shape_cast %108 : vector<1x1x32xf32> to vector<1x32xf32>
    %110 = vector.broadcast %109 : vector<1x32xf32> to vector<16x32xf32>
    %111 = arith.mulf %107, %110 : vector<16x32xf32>
    %c0_36 = arith.constant 0 : index
    %c0_37 = arith.constant 0 : index
    %c0_38 = arith.constant 0 : index
    %112 = vector.load %arg11[%c0_36, %c0_37, %c0_38] : memref<2x1x32xf32, #tpu.memory_space<vmem>>, vector<1x1x32xf32>
    %113 = vector.shape_cast %112 : vector<1x1x32xf32> to vector<1x32xf32>
    %114 = vector.broadcast %113 : vector<1x32xf32> to vector<16x32xf32>
    %115 = arith.addf %111, %114 : vector<16x32xf32>
    %c0_39 = arith.constant 0 : index
    %c0_40 = arith.constant 0 : index
    %c0_41 = arith.constant 0 : index
    %116 = vector.load %arg6[%c0_39, %c0_40, %c0_41] : memref<2x32x128xf32, #tpu.memory_space<vmem>>, vector<1x32x128xf32>
    %117 = vector.shape_cast %116 : vector<1x32x128xf32> to vector<32x128xf32>
    %cst_42 = arith.constant dense<0.000000e+00> : vector<16x128xf32>
    %118 = tpu.matmul %115, %117, %cst_42 {dimension_numbers = #tpu.dot_dimension_numbers<[1], [0], [0], [1], [0, 0, 1, 1], [], []>} : vector<16x32xf32>, vector<32x128xf32>, vector<16x128xf32> -> vector<16x128xf32>
    %c0_43 = arith.constant 0 : index
    %c0_44 = arith.constant 0 : index
    %c0_45 = arith.constant 0 : index
    %119 = vector.load %arg7[%c0_43, %c0_44, %c0_45] : memref<2x1x128xf32, #tpu.memory_space<vmem>>, vector<1x1x128xf32>
    %120 = vector.shape_cast %119 : vector<1x1x128xf32> to vector<1x128xf32>
    %121 = vector.broadcast %120 : vector<1x128xf32> to vector<16x128xf32>
    %122 = arith.addf %118, %121 : vector<16x128xf32>
    %cst_46 = arith.constant 0.000000e+00 : f32
    %123 = vector.broadcast %cst_46 : f32 to vector<16x128xf32>
    %124 = arith.maximumf %122, %123 : vector<16x128xf32>
    %c0_47 = arith.constant 0 : index
    %c0_48 = arith.constant 0 : index
    %c0_49 = arith.constant 0 : index
    %125 = vector.load %arg8[%c0_47, %c0_48, %c0_49] : memref<2x128x32xf32, #tpu.memory_space<vmem>>, vector<1x128x32xf32>
    %126 = vector.shape_cast %125 : vector<1x128x32xf32> to vector<128x32xf32>
    %cst_50 = arith.constant dense<0.000000e+00> : vector<16x32xf32>
    %127 = tpu.matmul %124, %126, %cst_50 {dimension_numbers = #tpu.dot_dimension_numbers<[1], [0], [0], [1], [0, 0, 1, 1], [], []>} : vector<16x128xf32>, vector<128x32xf32>, vector<16x32xf32> -> vector<16x32xf32>
    %c0_51 = arith.constant 0 : index
    %c0_52 = arith.constant 0 : index
    %c0_53 = arith.constant 0 : index
    %128 = vector.load %arg9[%c0_51, %c0_52, %c0_53] : memref<2x1x32xf32, #tpu.memory_space<vmem>>, vector<1x1x32xf32>
    %129 = vector.shape_cast %128 : vector<1x1x32xf32> to vector<1x32xf32>
    %130 = vector.broadcast %129 : vector<1x32xf32> to vector<16x32xf32>
    %131 = arith.addf %127, %130 : vector<16x32xf32>
    %132 = arith.addf %115, %131 : vector<16x32xf32>
    %cst_54 = arith.constant dense<0.000000e+00> : vector<16xf32>
    %133 = vector.multi_reduction <add>, %132, %cst_54 [1] : vector<16x32xf32> to vector<16xf32>
    %134 = vector.shape_cast %133 : vector<16xf32> to vector<16x1xf32>
    %cst_55 = arith.constant 3.200000e+01 : f32
    %135 = vector.broadcast %cst_55 : f32 to vector<16x1xf32>
    %136 = arith.divf %134, %135 : vector<16x1xf32>
    %137 = vector.broadcast %136 : vector<16x1xf32> to vector<16x32xf32>
    %138 = arith.subf %132, %137 : vector<16x32xf32>
    %139 = arith.mulf %138, %138 : vector<16x32xf32>
    %cst_56 = arith.constant dense<0.000000e+00> : vector<16xf32>
    %140 = vector.multi_reduction <add>, %139, %cst_56 [1] : vector<16x32xf32> to vector<16xf32>
    %141 = vector.shape_cast %140 : vector<16xf32> to vector<16x1xf32>
    %cst_57 = arith.constant 3.200000e+01 : f32
    %142 = vector.broadcast %cst_57 : f32 to vector<16x1xf32>
    %143 = arith.divf %141, %142 : vector<16x1xf32>
    %144 = vector.broadcast %136 : vector<16x1xf32> to vector<16x32xf32>
    %145 = arith.subf %132, %144 : vector<16x32xf32>
    %cst_58 = arith.constant 9.99999974E-6 : f32
    %146 = vector.broadcast %cst_58 : f32 to vector<16x1xf32>
    %147 = arith.addf %143, %146 : vector<16x1xf32>
    %148 = math.rsqrt %147 : vector<16x1xf32>
    %149 = vector.broadcast %148 : vector<16x1xf32> to vector<16x32xf32>
    %150 = arith.mulf %145, %149 : vector<16x32xf32>
    %c0_59 = arith.constant 0 : index
    %c0_60 = arith.constant 0 : index
    %c0_61 = arith.constant 0 : index
    %151 = vector.load %arg12[%c0_59, %c0_60, %c0_61] : memref<2x1x32xf32, #tpu.memory_space<vmem>>, vector<1x1x32xf32>
    %152 = vector.shape_cast %151 : vector<1x1x32xf32> to vector<1x32xf32>
    %153 = vector.broadcast %152 : vector<1x32xf32> to vector<16x32xf32>
    %154 = arith.mulf %150, %153 : vector<16x32xf32>
    %c0_62 = arith.constant 0 : index
    %c0_63 = arith.constant 0 : index
    %c0_64 = arith.constant 0 : index
    %155 = vector.load %arg13[%c0_62, %c0_63, %c0_64] : memref<2x1x32xf32, #tpu.memory_space<vmem>>, vector<1x1x32xf32>
    %156 = vector.shape_cast %155 : vector<1x1x32xf32> to vector<1x32xf32>
    %157 = vector.broadcast %156 : vector<1x32xf32> to vector<16x32xf32>
    %158 = arith.addf %154, %157 : vector<16x32xf32>
    %c1 = arith.constant 1 : index
    %c0_65 = arith.constant 0 : index
    %c0_66 = arith.constant 0 : index
    %159 = vector.load %arg2[%c1, %c0_65, %c0_66] : memref<2x32x96xf32, #tpu.memory_space<vmem>>, vector<1x32x96xf32>
    %160 = vector.shape_cast %159 : vector<1x32x96xf32> to vector<32x96xf32>
    %cst_67 = arith.constant dense<0.000000e+00> : vector<16x96xf32>
    %161 = tpu.matmul %158, %160, %cst_67 {dimension_numbers = #tpu.dot_dimension_numbers<[1], [0], [0], [1], [0, 0, 1, 1], [], []>} : vector<16x32xf32>, vector<32x96xf32>, vector<16x96xf32> -> vector<16x96xf32>
    %c1_68 = arith.constant 1 : index
    %c0_69 = arith.constant 0 : index
    %c0_70 = arith.constant 0 : index
    %162 = vector.load %arg3[%c1_68, %c0_69, %c0_70] : memref<2x1x96xf32, #tpu.memory_space<vmem>>, vector<1x1x96xf32>
    %163 = vector.shape_cast %162 : vector<1x1x96xf32> to vector<1x96xf32>
    %164 = vector.broadcast %163 : vector<1x96xf32> to vector<16x96xf32>
    %165 = arith.addf %161, %164 : vector<16x96xf32>
    %166 = vector.extract_strided_slice %165 {offsets = [0, 0], sizes = [8, 8], strides = [1, 1]} : vector<16x96xf32> to vector<8x8xf32>
    %167 = vector.shape_cast %166 : vector<8x8xf32> to vector<1x8x8xf32>
    %168 = vector.extract_strided_slice %165 {offsets = [0, 8], sizes = [8, 8], strides = [1, 1]} : vector<16x96xf32> to vector<8x8xf32>
    %169 = vector.shape_cast %168 : vector<8x8xf32> to vector<1x8x8xf32>
    %170 = vector.extract_strided_slice %165 {offsets = [0, 16], sizes = [8, 8], strides = [1, 1]} : vector<16x96xf32> to vector<8x8xf32>
    %171 = vector.shape_cast %170 : vector<8x8xf32> to vector<1x8x8xf32>
    %172 = vector.extract_strided_slice %165 {offsets = [0, 24], sizes = [8, 8], strides = [1, 1]} : vector<16x96xf32> to vector<8x8xf32>
    %173 = vector.shape_cast %172 : vector<8x8xf32> to vector<1x8x8xf32>
    %174 = vector.extract_strided_slice %165 {offsets = [8, 0], sizes = [8, 8], strides = [1, 1]} : vector<16x96xf32> to vector<8x8xf32>
    %175 = vector.shape_cast %174 : vector<8x8xf32> to vector<1x8x8xf32>
    %176 = vector.extract_strided_slice %165 {offsets = [8, 8], sizes = [8, 8], strides = [1, 1]} : vector<16x96xf32> to vector<8x8xf32>
    %177 = vector.shape_cast %176 : vector<8x8xf32> to vector<1x8x8xf32>
    %178 = vector.extract_strided_slice %165 {offsets = [8, 16], sizes = [8, 8], strides = [1, 1]} : vector<16x96xf32> to vector<8x8xf32>
    %179 = vector.shape_cast %178 : vector<8x8xf32> to vector<1x8x8xf32>
    %180 = vector.extract_strided_slice %165 {offsets = [8, 24], sizes = [8, 8], strides = [1, 1]} : vector<16x96xf32> to vector<8x8xf32>
    %181 = vector.shape_cast %180 : vector<8x8xf32> to vector<1x8x8xf32>
    %182 = tpu.concatenate %167, %169, %171, %173, %175, %177, %179, %181 in 0 : vector<1x8x8xf32>, vector<1x8x8xf32>, vector<1x8x8xf32>, vector<1x8x8xf32>, vector<1x8x8xf32>, vector<1x8x8xf32>, vector<1x8x8xf32>, vector<1x8x8xf32> -> vector<8x8x8xf32>
    %183 = vector.extract_strided_slice %165 {offsets = [0, 32], sizes = [8, 8], strides = [1, 1]} : vector<16x96xf32> to vector<8x8xf32>
    %184 = vector.shape_cast %183 : vector<8x8xf32> to vector<1x8x8xf32>
    %185 = vector.extract_strided_slice %165 {offsets = [0, 40], sizes = [8, 8], strides = [1, 1]} : vector<16x96xf32> to vector<8x8xf32>
    %186 = vector.shape_cast %185 : vector<8x8xf32> to vector<1x8x8xf32>
    %187 = vector.extract_strided_slice %165 {offsets = [0, 48], sizes = [8, 8], strides = [1, 1]} : vector<16x96xf32> to vector<8x8xf32>
    %188 = vector.shape_cast %187 : vector<8x8xf32> to vector<1x8x8xf32>
    %189 = vector.extract_strided_slice %165 {offsets = [0, 56], sizes = [8, 8], strides = [1, 1]} : vector<16x96xf32> to vector<8x8xf32>
    %190 = vector.shape_cast %189 : vector<8x8xf32> to vector<1x8x8xf32>
    %191 = vector.extract_strided_slice %165 {offsets = [8, 32], sizes = [8, 8], strides = [1, 1]} : vector<16x96xf32> to vector<8x8xf32>
    %192 = vector.shape_cast %191 : vector<8x8xf32> to vector<1x8x8xf32>
    %193 = vector.extract_strided_slice %165 {offsets = [8, 40], sizes = [8, 8], strides = [1, 1]} : vector<16x96xf32> to vector<8x8xf32>
    %194 = vector.shape_cast %193 : vector<8x8xf32> to vector<1x8x8xf32>
    %195 = vector.extract_strided_slice %165 {offsets = [8, 48], sizes = [8, 8], strides = [1, 1]} : vector<16x96xf32> to vector<8x8xf32>
    %196 = vector.shape_cast %195 : vector<8x8xf32> to vector<1x8x8xf32>
    %197 = vector.extract_strided_slice %165 {offsets = [8, 56], sizes = [8, 8], strides = [1, 1]} : vector<16x96xf32> to vector<8x8xf32>
    %198 = vector.shape_cast %197 : vector<8x8xf32> to vector<1x8x8xf32>
    %199 = tpu.concatenate %184, %186, %188, %190, %192, %194, %196, %198 in 0 : vector<1x8x8xf32>, vector<1x8x8xf32>, vector<1x8x8xf32>, vector<1x8x8xf32>, vector<1x8x8xf32>, vector<1x8x8xf32>, vector<1x8x8xf32>, vector<1x8x8xf32> -> vector<8x8x8xf32>
    %200 = vector.extract_strided_slice %165 {offsets = [0, 64], sizes = [8, 8], strides = [1, 1]} : vector<16x96xf32> to vector<8x8xf32>
    %201 = vector.shape_cast %200 : vector<8x8xf32> to vector<1x8x8xf32>
    %202 = vector.extract_strided_slice %165 {offsets = [0, 72], sizes = [8, 8], strides = [1, 1]} : vector<16x96xf32> to vector<8x8xf32>
    %203 = vector.shape_cast %202 : vector<8x8xf32> to vector<1x8x8xf32>
    %204 = vector.extract_strided_slice %165 {offsets = [0, 80], sizes = [8, 8], strides = [1, 1]} : vector<16x96xf32> to vector<8x8xf32>
    %205 = vector.shape_cast %204 : vector<8x8xf32> to vector<1x8x8xf32>
    %206 = vector.extract_strided_slice %165 {offsets = [0, 88], sizes = [8, 8], strides = [1, 1]} : vector<16x96xf32> to vector<8x8xf32>
    %207 = vector.shape_cast %206 : vector<8x8xf32> to vector<1x8x8xf32>
    %208 = vector.extract_strided_slice %165 {offsets = [8, 64], sizes = [8, 8], strides = [1, 1]} : vector<16x96xf32> to vector<8x8xf32>
    %209 = vector.shape_cast %208 : vector<8x8xf32> to vector<1x8x8xf32>
    %210 = vector.extract_strided_slice %165 {offsets = [8, 72], sizes = [8, 8], strides = [1, 1]} : vector<16x96xf32> to vector<8x8xf32>
    %211 = vector.shape_cast %210 : vector<8x8xf32> to vector<1x8x8xf32>
    %212 = vector.extract_strided_slice %165 {offsets = [8, 80], sizes = [8, 8], strides = [1, 1]} : vector<16x96xf32> to vector<8x8xf32>
    %213 = vector.shape_cast %212 : vector<8x8xf32> to vector<1x8x8xf32>
    %214 = vector.extract_strided_slice %165 {offsets = [8, 88], sizes = [8, 8], strides = [1, 1]} : vector<16x96xf32> to vector<8x8xf32>
    %215 = vector.shape_cast %214 : vector<8x8xf32> to vector<1x8x8xf32>
    %216 = tpu.concatenate %201, %203, %205, %207, %209, %211, %213, %215 in 0 : vector<1x8x8xf32>, vector<1x8x8xf32>, vector<1x8x8xf32>, vector<1x8x8xf32>, vector<1x8x8xf32>, vector<1x8x8xf32>, vector<1x8x8xf32>, vector<1x8x8xf32> -> vector<8x8x8xf32>
    "tpu.trace_start"() <{level = 10 : i32, message = "gqd,gkd->gqk"}> : () -> ()
    %cst_71 = arith.constant dense<0.000000e+00> : vector<8x8x8xf32>
    %217 = tpu.matmul %182, %199, %cst_71 {dimension_numbers = #tpu.dot_dimension_numbers<[2], [2], [1], [1], [0, 0, 0, 1, 1, 1], [0], [0]>} : vector<8x8x8xf32>, vector<8x8x8xf32>, vector<8x8x8xf32> -> vector<8x8x8xf32>
    "tpu.trace_stop"() : () -> ()
    %cst_72 = arith.constant 0.353553385 : f32
    %218 = vector.broadcast %cst_72 : f32 to vector<8x8x8xf32>
    %219 = arith.mulf %217, %218 : vector<8x8x8xf32>
    %cst_73 = arith.constant dense<0xFF800000> : vector<8x8xf32>
    %220 = vector.multi_reduction <maximumf>, %219, %cst_73 [2] : vector<8x8x8xf32> to vector<8x8xf32>
    %221 = vector.shape_cast %220 : vector<8x8xf32> to vector<8x8x1xf32>
    %222 = vector.broadcast %221 : vector<8x8x1xf32> to vector<8x8x8xf32>
    %223 = arith.subf %219, %222 : vector<8x8x8xf32>
    %224 = math.exp %223 : vector<8x8x8xf32>
    %cst_74 = arith.constant dense<0.000000e+00> : vector<8x8xf32>
    %225 = vector.multi_reduction <add>, %224, %cst_74 [2] : vector<8x8x8xf32> to vector<8x8xf32>
    %226 = vector.shape_cast %225 : vector<8x8xf32> to vector<8x8x1xf32>
    %227 = tpu.reciprocal %226 {approx = true} : vector<8x8x1xf32> -> vector<8x8x1xf32>
    %228 = vector.broadcast %227 : vector<8x8x1xf32> to vector<8x8x8xf32>
    %229 = arith.mulf %224, %228 : vector<8x8x8xf32>
    "tpu.trace_start"() <{level = 10 : i32, message = "gqk,gkd->gqd"}> : () -> ()
    %cst_75 = arith.constant dense<0.000000e+00> : vector<8x8x8xf32>
    %230 = tpu.matmul %229, %216, %cst_75 {dimension_numbers = #tpu.dot_dimension_numbers<[2], [1], [1], [2], [0, 0, 0, 1, 1, 2], [0], [0]>} : vector<8x8x8xf32>, vector<8x8x8xf32>, vector<8x8x8xf32> -> vector<8x8x8xf32>
    "tpu.trace_stop"() : () -> ()
    %231 = vector.extract_strided_slice %230 {offsets = [0, 0, 0], sizes = [4, 8, 8], strides = [1, 1, 1]} : vector<8x8x8xf32> to vector<4x8x8xf32>
    %c1_76 = arith.constant 1 : index
    %c0_77 = arith.constant 0 : index
    %c0_78 = arith.constant 0 : index
    %c0_79 = arith.constant 0 : index
    %232 = vector.load %arg4[%c1_76, %c0_77, %c0_78, %c0_79] : memref<2x4x8x32xf32, #tpu.memory_space<vmem>>, vector<1x4x8x32xf32>
    %233 = vector.shape_cast %232 : vector<1x4x8x32xf32> to vector<4x8x32xf32>
    "tpu.trace_start"() <{level = 10 : i32, message = "hqd,hde->hqe"}> : () -> ()
    %cst_80 = arith.constant dense<0.000000e+00> : vector<4x8x32xf32>
    %234 = tpu.matmul %231, %233, %cst_80 {dimension_numbers = #tpu.dot_dimension_numbers<[2], [1], [1], [2], [0, 0, 0, 1, 1, 2], [0], [0]>} : vector<4x8x8xf32>, vector<4x8x32xf32>, vector<4x8x32xf32> -> vector<4x8x32xf32>
    "tpu.trace_stop"() : () -> ()
    %cst_81 = arith.constant dense<0.000000e+00> : vector<8x32xf32>
    %235 = vector.multi_reduction <add>, %234, %cst_81 [0] : vector<4x8x32xf32> to vector<8x32xf32>
    %236 = vector.extract_strided_slice %230 {offsets = [4, 0, 0], sizes = [4, 8, 8], strides = [1, 1, 1]} : vector<8x8x8xf32> to vector<4x8x8xf32>
    %c1_82 = arith.constant 1 : index
    %c0_83 = arith.constant 0 : index
    %c0_84 = arith.constant 0 : index
    %c0_85 = arith.constant 0 : index
    %237 = vector.load %arg4[%c1_82, %c0_83, %c0_84, %c0_85] : memref<2x4x8x32xf32, #tpu.memory_space<vmem>>, vector<1x4x8x32xf32>
    %238 = vector.shape_cast %237 : vector<1x4x8x32xf32> to vector<4x8x32xf32>
    "tpu.trace_start"() <{level = 10 : i32, message = "hqd,hde->hqe"}> : () -> ()
    %cst_86 = arith.constant dense<0.000000e+00> : vector<4x8x32xf32>
    %239 = tpu.matmul %236, %238, %cst_86 {dimension_numbers = #tpu.dot_dimension_numbers<[2], [1], [1], [2], [0, 0, 0, 1, 1, 2], [0], [0]>} : vector<4x8x8xf32>, vector<4x8x32xf32>, vector<4x8x32xf32> -> vector<4x8x32xf32>
    "tpu.trace_stop"() : () -> ()
    %cst_87 = arith.constant dense<0.000000e+00> : vector<8x32xf32>
    %240 = vector.multi_reduction <add>, %239, %cst_87 [0] : vector<4x8x32xf32> to vector<8x32xf32>
    %241 = tpu.concatenate %235, %240 in 0 : vector<8x32xf32>, vector<8x32xf32> -> vector<16x32xf32>
    %c1_88 = arith.constant 1 : index
    %c0_89 = arith.constant 0 : index
    %c0_90 = arith.constant 0 : index
    %242 = vector.load %arg5[%c1_88, %c0_89, %c0_90] : memref<2x1x32xf32, #tpu.memory_space<vmem>>, vector<1x1x32xf32>
    %243 = vector.shape_cast %242 : vector<1x1x32xf32> to vector<1x32xf32>
    %244 = vector.broadcast %243 : vector<1x32xf32> to vector<16x32xf32>
    %245 = arith.addf %241, %244 : vector<16x32xf32>
    %246 = arith.addf %158, %245 : vector<16x32xf32>
    %cst_91 = arith.constant dense<0.000000e+00> : vector<16xf32>
    %247 = vector.multi_reduction <add>, %246, %cst_91 [1] : vector<16x32xf32> to vector<16xf32>
    %248 = vector.shape_cast %247 : vector<16xf32> to vector<16x1xf32>
    %cst_92 = arith.constant 3.200000e+01 : f32
    %249 = vector.broadcast %cst_92 : f32 to vector<16x1xf32>
    %250 = arith.divf %248, %249 : vector<16x1xf32>
    %251 = vector.broadcast %250 : vector<16x1xf32> to vector<16x32xf32>
    %252 = arith.subf %246, %251 : vector<16x32xf32>
    %253 = arith.mulf %252, %252 : vector<16x32xf32>
    %cst_93 = arith.constant dense<0.000000e+00> : vector<16xf32>
    %254 = vector.multi_reduction <add>, %253, %cst_93 [1] : vector<16x32xf32> to vector<16xf32>
    %255 = vector.shape_cast %254 : vector<16xf32> to vector<16x1xf32>
    %cst_94 = arith.constant 3.200000e+01 : f32
    %256 = vector.broadcast %cst_94 : f32 to vector<16x1xf32>
    %257 = arith.divf %255, %256 : vector<16x1xf32>
    %258 = vector.broadcast %250 : vector<16x1xf32> to vector<16x32xf32>
    %259 = arith.subf %246, %258 : vector<16x32xf32>
    %cst_95 = arith.constant 9.99999974E-6 : f32
    %260 = vector.broadcast %cst_95 : f32 to vector<16x1xf32>
    %261 = arith.addf %257, %260 : vector<16x1xf32>
    %262 = math.rsqrt %261 : vector<16x1xf32>
    %263 = vector.broadcast %262 : vector<16x1xf32> to vector<16x32xf32>
    %264 = arith.mulf %259, %263 : vector<16x32xf32>
    %c1_96 = arith.constant 1 : index
    %c0_97 = arith.constant 0 : index
    %c0_98 = arith.constant 0 : index
    %265 = vector.load %arg10[%c1_96, %c0_97, %c0_98] : memref<2x1x32xf32, #tpu.memory_space<vmem>>, vector<1x1x32xf32>
    %266 = vector.shape_cast %265 : vector<1x1x32xf32> to vector<1x32xf32>
    %267 = vector.broadcast %266 : vector<1x32xf32> to vector<16x32xf32>
    %268 = arith.mulf %264, %267 : vector<16x32xf32>
    %c1_99 = arith.constant 1 : index
    %c0_100 = arith.constant 0 : index
    %c0_101 = arith.constant 0 : index
    %269 = vector.load %arg11[%c1_99, %c0_100, %c0_101] : memref<2x1x32xf32, #tpu.memory_space<vmem>>, vector<1x1x32xf32>
    %270 = vector.shape_cast %269 : vector<1x1x32xf32> to vector<1x32xf32>
    %271 = vector.broadcast %270 : vector<1x32xf32> to vector<16x32xf32>
    %272 = arith.addf %268, %271 : vector<16x32xf32>
    %c1_102 = arith.constant 1 : index
    %c0_103 = arith.constant 0 : index
    %c0_104 = arith.constant 0 : index
    %273 = vector.load %arg6[%c1_102, %c0_103, %c0_104] : memref<2x32x128xf32, #tpu.memory_space<vmem>>, vector<1x32x128xf32>
    %274 = vector.shape_cast %273 : vector<1x32x128xf32> to vector<32x128xf32>
    %cst_105 = arith.constant dense<0.000000e+00> : vector<16x128xf32>
    %275 = tpu.matmul %272, %274, %cst_105 {dimension_numbers = #tpu.dot_dimension_numbers<[1], [0], [0], [1], [0, 0, 1, 1], [], []>} : vector<16x32xf32>, vector<32x128xf32>, vector<16x128xf32> -> vector<16x128xf32>
    %c1_106 = arith.constant 1 : index
    %c0_107 = arith.constant 0 : index
    %c0_108 = arith.constant 0 : index
    %276 = vector.load %arg7[%c1_106, %c0_107, %c0_108] : memref<2x1x128xf32, #tpu.memory_space<vmem>>, vector<1x1x128xf32>
    %277 = vector.shape_cast %276 : vector<1x1x128xf32> to vector<1x128xf32>
    %278 = vector.broadcast %277 : vector<1x128xf32> to vector<16x128xf32>
    %279 = arith.addf %275, %278 : vector<16x128xf32>
    %cst_109 = arith.constant 0.000000e+00 : f32
    %280 = vector.broadcast %cst_109 : f32 to vector<16x128xf32>
    %281 = arith.maximumf %279, %280 : vector<16x128xf32>
    %c1_110 = arith.constant 1 : index
    %c0_111 = arith.constant 0 : index
    %c0_112 = arith.constant 0 : index
    %282 = vector.load %arg8[%c1_110, %c0_111, %c0_112] : memref<2x128x32xf32, #tpu.memory_space<vmem>>, vector<1x128x32xf32>
    %283 = vector.shape_cast %282 : vector<1x128x32xf32> to vector<128x32xf32>
    %cst_113 = arith.constant dense<0.000000e+00> : vector<16x32xf32>
    %284 = tpu.matmul %281, %283, %cst_113 {dimension_numbers = #tpu.dot_dimension_numbers<[1], [0], [0], [1], [0, 0, 1, 1], [], []>} : vector<16x128xf32>, vector<128x32xf32>, vector<16x32xf32> -> vector<16x32xf32>
    %c1_114 = arith.constant 1 : index
    %c0_115 = arith.constant 0 : index
    %c0_116 = arith.constant 0 : index
    %285 = vector.load %arg9[%c1_114, %c0_115, %c0_116] : memref<2x1x32xf32, #tpu.memory_space<vmem>>, vector<1x1x32xf32>
    %286 = vector.shape_cast %285 : vector<1x1x32xf32> to vector<1x32xf32>
    %287 = vector.broadcast %286 : vector<1x32xf32> to vector<16x32xf32>
    %288 = arith.addf %284, %287 : vector<16x32xf32>
    %289 = arith.addf %272, %288 : vector<16x32xf32>
    %cst_117 = arith.constant dense<0.000000e+00> : vector<16xf32>
    %290 = vector.multi_reduction <add>, %289, %cst_117 [1] : vector<16x32xf32> to vector<16xf32>
    %291 = vector.shape_cast %290 : vector<16xf32> to vector<16x1xf32>
    %cst_118 = arith.constant 3.200000e+01 : f32
    %292 = vector.broadcast %cst_118 : f32 to vector<16x1xf32>
    %293 = arith.divf %291, %292 : vector<16x1xf32>
    %294 = vector.broadcast %293 : vector<16x1xf32> to vector<16x32xf32>
    %295 = arith.subf %289, %294 : vector<16x32xf32>
    %296 = arith.mulf %295, %295 : vector<16x32xf32>
    %cst_119 = arith.constant dense<0.000000e+00> : vector<16xf32>
    %297 = vector.multi_reduction <add>, %296, %cst_119 [1] : vector<16x32xf32> to vector<16xf32>
    %298 = vector.shape_cast %297 : vector<16xf32> to vector<16x1xf32>
    %cst_120 = arith.constant 3.200000e+01 : f32
    %299 = vector.broadcast %cst_120 : f32 to vector<16x1xf32>
    %300 = arith.divf %298, %299 : vector<16x1xf32>
    %301 = vector.broadcast %293 : vector<16x1xf32> to vector<16x32xf32>
    %302 = arith.subf %289, %301 : vector<16x32xf32>
    %cst_121 = arith.constant 9.99999974E-6 : f32
    %303 = vector.broadcast %cst_121 : f32 to vector<16x1xf32>
    %304 = arith.addf %300, %303 : vector<16x1xf32>
    %305 = math.rsqrt %304 : vector<16x1xf32>
    %306 = vector.broadcast %305 : vector<16x1xf32> to vector<16x32xf32>
    %307 = arith.mulf %302, %306 : vector<16x32xf32>
    %c1_122 = arith.constant 1 : index
    %c0_123 = arith.constant 0 : index
    %c0_124 = arith.constant 0 : index
    %308 = vector.load %arg12[%c1_122, %c0_123, %c0_124] : memref<2x1x32xf32, #tpu.memory_space<vmem>>, vector<1x1x32xf32>
    %309 = vector.shape_cast %308 : vector<1x1x32xf32> to vector<1x32xf32>
    %310 = vector.broadcast %309 : vector<1x32xf32> to vector<16x32xf32>
    %311 = arith.mulf %307, %310 : vector<16x32xf32>
    %c1_125 = arith.constant 1 : index
    %c0_126 = arith.constant 0 : index
    %c0_127 = arith.constant 0 : index
    %312 = vector.load %arg13[%c1_125, %c0_126, %c0_127] : memref<2x1x32xf32, #tpu.memory_space<vmem>>, vector<1x1x32xf32>
    %313 = vector.shape_cast %312 : vector<1x1x32xf32> to vector<1x32xf32>
    %314 = vector.broadcast %313 : vector<1x32xf32> to vector<16x32xf32>
    %315 = arith.addf %311, %314 : vector<16x32xf32>
    %316 = vector.shape_cast %315 : vector<16x32xf32> to vector<2x8x32xf32>
    %c0_128 = arith.constant 0 : index
    %c0_129 = arith.constant 0 : index
    %c0_130 = arith.constant 0 : index
    %317 = vector.load %arg14[%c0_128, %c0_129, %c0_130] : memref<2x8x32xf32, #tpu.memory_space<vmem>>, vector<2x8x32xf32>
    tpu.vector_store %arg14[%c0_128, %c0_129, %c0_130], %316 {strides = array<i32>} : memref<2x8x32xf32, #tpu.memory_space<vmem>>, vector<2x8x32xf32>,
    return
  }
  func.func @transform_0(%arg0: i32) -> (i32, i32, i32) {
    %c0_i32 = arith.constant 0 : i32
    %c0_i32_0 = arith.constant 0 : i32
    %c0_i32_1 = arith.constant 0 : i32
    %c0_i32_2 = arith.constant 0 : i32
    return %c0_i32, %c0_i32_0, %c0_i32_1 : i32, i32, i32
  }
  func.func @transform_1(%arg0: i32) -> (i32, i32, i32) {
    %c0_i32 = arith.constant 0 : i32
    %c0_i32_0 = arith.constant 0 : i32
    %c0_i32_1 = arith.constant 0 : i32
    %c0_i32_2 = arith.constant 0 : i32
    return %c0_i32, %c0_i32_0, %c0_i32_1 : i32, i32, i32
  }
  func.func @transform_2(%arg0: i32) -> (i32, i32, i32) {
    %c0_i32 = arith.constant 0 : i32
    %c0_i32_0 = arith.constant 0 : i32
    %c0_i32_1 = arith.constant 0 : i32
    %c0_i32_2 = arith.constant 0 : i32
    return %c0_i32, %c0_i32_0, %c0_i32_1 : i32, i32, i32
  }
  func.func @transform_3(%arg0: i32) -> (i32, i32, i32, i32) {
    %c0_i32 = arith.constant 0 : i32
    %c0_i32_0 = arith.constant 0 : i32
    %c0_i32_1 = arith.constant 0 : i32
    %c0_i32_2 = arith.constant 0 : i32
    %c0_i32_3 = arith.constant 0 : i32
    return %c0_i32, %c0_i32_0, %c0_i32_1, %c0_i32_2 : i32, i32, i32, i32
  }
  func.func @transform_4(%arg0: i32) -> (i32, i32, i32) {
    %c0_i32 = arith.constant 0 : i32
    %c0_i32_0 = arith.constant 0 : i32
    %c0_i32_1 = arith.constant 0 : i32
    %c0_i32_2 = arith.constant 0 : i32
    return %c0_i32, %c0_i32_0, %c0_i32_1 : i32, i32, i32
  }
  func.func @transform_5(%arg0: i32) -> (i32, i32, i32) {
    %c0_i32 = arith.constant 0 : i32
    %c0_i32_0 = arith.constant 0 : i32
    %c0_i32_1 = arith.constant 0 : i32
    %c0_i32_2 = arith.constant 0 : i32
    return %c0_i32, %c0_i32_0, %c0_i32_1 : i32, i32, i32
  }
  func.func @transform_6(%arg0: i32) -> (i32, i32, i32) {
    %c0_i32 = arith.constant 0 : i32
    %c0_i32_0 = arith.constant 0 : i32
    %c0_i32_1 = arith.constant 0 : i32
    %c0_i32_2 = arith.constant 0 : i32
    return %c0_i32, %c0_i32_0, %c0_i32_1 : i32, i32, i32
  }
  func.func @transform_7(%arg0: i32) -> (i32, i32, i32) {
    %c0_i32 = arith.constant 0 : i32
    %c0_i32_0 = arith.constant 0 : i32
    %c0_i32_1 = arith.constant 0 : i32
    %c0_i32_2 = arith.constant 0 : i32
    return %c0_i32, %c0_i32_0, %c0_i32_1 : i32, i32, i32
  }
  func.func @transform_8(%arg0: i32) -> (i32, i32, i32) {
    %c0_i32 = arith.constant 0 : i32
    %c0_i32_0 = arith.constant 0 : i32
    %c0_i32_1 = arith.constant 0 : i32
    %c0_i32_2 = arith.constant 0 : i32
    return %c0_i32, %c0_i32_0, %c0_i32_1 : i32, i32, i32
  }
  func.func @transform_9(%arg0: i32) -> (i32, i32, i32) {
    %c0_i32 = arith.constant 0 : i32
    %c0_i32_0 = arith.constant 0 : i32
    %c0_i32_1 = arith.constant 0 : i32
    %c0_i32_2 = arith.constant 0 : i32
    return %c0_i32, %c0_i32_0, %c0_i32_1 : i32, i32, i32
  }
  func.func @transform_10(%arg0: i32) -> (i32, i32, i32) {
    %c0_i32 = arith.constant 0 : i32
    %c0_i32_0 = arith.constant 0 : i32
    %c0_i32_1 = arith.constant 0 : i32
    %c0_i32_2 = arith.constant 0 : i32
    return %c0_i32, %c0_i32_0, %c0_i32_1 : i32, i32, i32
  }
  func.func @transform_11(%arg0: i32) -> (i32, i32, i32) {
    %c0_i32 = arith.constant 0 : i32
    %c0_i32_0 = arith.constant 0 : i32
    %c0_i32_1 = arith.constant 0 : i32
    %c0_i32_2 = arith.constant 0 : i32
    return %c0_i32, %c0_i32_0, %c0_i32_1 : i32, i32, i32
  }
  func.func @transform_12(%arg0: i32) -> (i32, i32, i32) {
    %c0_i32 = arith.constant 0 : i32
    %c0_i32_0 = arith.constant 0 : i32
    %c0_i32_1 = arith.constant 0 : i32
    %c0_i32_2 = arith.constant 0 : i32
    return %c0_i32, %c0_i32_0, %c0_i32_1 : i32, i32, i32
  }
  func.func @transform_13(%arg0: i32) -> (i32, i32, i32) {
    %c0_i32 = arith.constant 0 : i32
    %c0_i32_0 = arith.constant 0 : i32
    %c0_i32_1 = arith.constant 0 : i32
    %c0_i32_2 = arith.constant 0 : i32
    return %c0_i32, %c0_i32_0, %c0_i32_1 : i32, i32, i32
  }
}

</mosaic_0001>

<bundles_post_ra>
// kernel: tpu_custom_call.1
= control target key start
LH: loop header
LB: loop body
LE: loop exit
PB: predicated region body
PF: predicated region fallthrough
CT: control target
= control target key end

     0   :  { %vm55_vm0 = vcmask 261120   ;;  %s2969_s0 = inlined_call_operand.vmem [shape: f32[2,8,32], index: 0, kind: input, shape index: {}]   ;;  %s2970_s1 = inlined_call_operand.vmem [shape: f32[2,32,96], index: 1, kind: input, shape index: {}]   ;;  %s2971_s2 = inlined_call_operand.vmem [shape: f32[2,1,96], index: 2, kind: input, shape index: {}]   ;;  %s2972_s3 = inlined_call_operand.vmem [shape: f32[2,4,8,32], index: 3, kind: input, shape index: {}]   ;;  %s2973_s4 = inlined_call_operand.vmem [shape: f32[2,1,32], index: 4, kind: input, shape index: {}]   ;;  %s2974_s5 = inlined_call_operand.vmem [shape: f32[2,32,128], index: 5, kind: input, shape index: {}]   ;;  %s2975_s6 = inlined_call_operand.vmem [shape: f32[2,1,128], index: 6, kind: input, shape index: {}]   ;;  %s2976_s7 = inlined_call_operand.vmem [shape: f32[2,128,32], index: 7, kind: input, shape index: {}]   ;;  %s2977_s8 = inlined_call_operand.vmem [shape: f32[2,1,32], index: 8, kind: input, shape index: {}]   ;;  %s2978_s9 = inlined_call_operand.vmem [shape: f32[2,1,32], index: 9, kind: input, shape index: {}]   ;;  %s2979_s10 = inlined_call_operand.vmem [shape: f32[2,1,32], index: 10, kind: input, shape index: {}]   ;;  %s2980_s11 = inlined_call_operand.vmem [shape: f32[2,1,32], index: 11, kind: input, shape index: {}]   ;;  %s2981_s12 = inlined_call_operand.vmem [shape: f32[2,1,32], index: 12, kind: input, shape index: {}]   ;;  %s2982_s13 = inlined_call_operand.hbm [shape: f32[2,8,32], index: 13, kind: output, shape index: {}]  }
   0x1   :  { %v50_v0 = vld [vmem:[%s2970_s1 + $0x18] sm:$0xff]  ;;  %v49_v1 = vld [vmem:[%s2970_s1 + $0x10] sm:$0xff]  ;;  %v48_v2 = vld [vmem:[%s2970_s1 + $0x8] sm:$0xff] }
   0x2   :  { %74 = vmatpush.msra.mxu0 %v50_v0  ;;  %v47_v3 = vld [vmem:[%s2970_s1] sm:$0xff] }
   0x3   :  { %v2413_v4 = vld [vmem:[%s2969_s0] sm:$0xff] }
   0x4   :  { %75 = vmatpush.msra.mxu0 %v49_v1 }
   0x6   :  { %76 = vmatpush.msra.mxu0 %v48_v2 }
   0x8   :  { %77 = vmatpush.msra.mxu0 %v47_v3 }
   0x9   :  { %2034 = vmatmul.msk.f32.vlgmr.msra.gmra.mxu0 %vm55_vm0, %v2413_v4 }
   0xa   :  { %18 = vsyncpa [#allocation3], 0  ;;  %v2420_v5 = vld [vmem:[%s2969_s0 + $0x8] sm:$0xff]  ;;  %v2195_v6 = vld [vmem:[%s2971_s2] ss:$0 sm:$0xff]  ;;  %s2319_s22 = smov 112  }
   0xb   :  { %s2320_s23 = smov 120   ;;  %s2321_s0 = smov 104   ;;  %vm101_vm1 = vcmask 64512  }
   0xc   :  { %s2322_s24 = smov 96   ;;  %s2323_s25 = smov 64  }
   0xd   :  { %s2022_s21 = sshll.u32 %s2982_s13, 4  ;;  %s2327_s26 = smov 8   ;;  %s2023_s21 = int_to_ptr.hbm [resolvable:$true] %s2022_s21 }
  0x11   :  { %2035 = vmatmul.msk.f32.gmra.mxu0 %vm55_vm0, %v2420_v5 }
  0x86   :  { %v79_v7 = vpop.f32.mrf.mxu0 }
  0x87   :  { %v2427_v8 = vadd.f32 %v2195_v6, %v79_v7 }
  0x89   :  { %88 = vrot.lane.b32.xlu1 %v2427_v8, %s2319_s22  ;;  %86 = vrot.lane.b32.xlu0 %v2427_v8, %s2320_s23 }
  0x8e   :  { %v82_v9 = vpop.f32.mrf.mxu0 }
  0x8f   :  { %v2433_v10 = vadd.f32 %v2195_v6, %v82_v9 }
  0x91   :  { %97 = vrot.lane.b32.xlu1 %v2433_v10, %s2321_s0  ;;  %90 = vrot.lane.b32.xlu0 %v2427_v8, %s2321_s0 }
  0x92   :  { %93 = vrot.lane.b32.xlu2 %v2433_v10, %s2320_s23 }
  0x99   :  { %99 = vrot.lane.b32.xlu0 %v2427_v8, %s2322_s24 }
  0x9a   :  { %95 = vrot.lane.b32.xlu2 %v2433_v10, %s2319_s22 }
  0xa1   :  { %204 = vrot.lane.b32.xlu0 %v2433_v10, %s2322_s24 }
  0xec   :  { %v2447_v11 = vpop.permute.xlu2 %93 }
  0xed   :  { %230 = vrot.lane.b32.xlu0 %v2447_v11, %s2322_s24 }
  0xf4   :  { %v2463_v15 = vpop.permute.xlu2 %95 }
  0xfb   :  { %v2451_v12 = vpop.permute.xlu0 %86  ;;  %v2455_v13 = vpop.permute.xlu1 %88 }
  0xfc   :  { %126 = vrot.lane.b32.xlu1 %v2451_v12, %s2322_s24 }
 0x103   :  { %v2457_v14 = vpop.permute.xlu0 %90  ;;  %v2465_v17 = vpop.permute.xlu1 %97 }
 0x104   :  { %152 = vrot.lane.b32.xlu1 %v2455_v13, %s2322_s24  ;;  %178 = vrot.lane.b32.xlu2 %v2457_v14, %s2322_s24  ;;  %v2155_v54 = vpack.i.bf16 %v2457_v14, %v2427_v8 }
 0x10b   :  { %v100_v16 = vpop.permute.xlu0 %99 }
 0x10c   :  { %256 = vrot.lane.b32.xlu1 %v2463_v15, %s2322_s24  ;;  %2036 = vmatpush.xpose.msk.msra.mxu3 %vm101_vm1, %v100_v16 }
 0x10d   :  { %282 = vrot.lane.b32.xlu2 %v2465_v17, %s2322_s24 }
 0x10f   :  { %2037 = vmatmul.msk.f32.vlgmr.msra.gmra.mxu3 %vm101_vm1, %v2427_v8 }
 0x113   :  { %v205_v19 = vpop.permute.xlu0 %204 }
 0x15e   :  { %v179_v18 = vpop.permute.xlu2 %178 }
 0x15f   :  { %2042 = vmatpush.xpose.msk.msra.mxu1 %vm101_vm1, %v179_v18  ;;  %v231_v22 = vpop.permute.xlu0 %230 }
 0x162   :  { %2043 = vmatmul.msk.f32.vlgmr.msra.gmra.mxu1 %vm101_vm1, %v2457_v14 }
 0x167   :  { %v283_v21 = vpop.permute.xlu2 %282 }
 0x16e   :  { %v127_v20 = vpop.permute.xlu1 %126 }
 0x16f   :  { %2038 = vmatpush.xpose.msk.msra.mxu2 %vm101_vm1, %v127_v20 }
 0x172   :  { %2039 = vmatmul.msk.f32.vlgmr.msra.gmra.mxu2 %vm101_vm1, %v2451_v12 }
 0x173   :  { %2044 = vmatpush.xpose.msk.msrb.mxu2 %vm101_vm1, %v205_v19 }
 0x176   :  { %v153_v23 = vpop.permute.xlu1 %152 }
 0x177   :  { %2050 = vmatpush.xpose.msk.msra.mxu2 %vm101_vm1, %v283_v21  ;;  %2040 = vmatpush.xpose.msk.msrb.mxu3 %vm101_vm1, %v153_v23 }
 0x17a   :  { %2041 = vmatmul.msk.f32.vlgmr.msrb.gmra.mxu3 %vm101_vm1, %v2455_v13  ;;  %2045 = vmatmul.msk.f32.vlgmr.msrb.gmra.mxu2 %vm101_vm1, %v2433_v10 }
 0x17b   :  { %2046 = vmatpush.xpose.msk.msra.mxu3 %vm101_vm1, %v231_v22 }
 0x17e   :  { %v257_v24 = vpop.permute.xlu1 %256 }
 0x17f   :  { %2048 = vmatpush.xpose.msk.msrb.mxu1 %vm101_vm1, %v257_v24 }
 0x182   :  { %2047 = vmatmul.msk.f32.vlgmr.msra.gmra.mxu3 %vm101_vm1, %v2447_v11  ;;  %2049 = vmatmul.msk.f32.vlgmr.msrb.gmra.mxu1 %vm101_vm1, %v2463_v15 }
 0x183   :  { %2051 = vmatmul.msk.f32.vlgmr.msra.gmra.mxu2 %vm101_vm1, %v2465_v17 }
 0x192   :  { %v123_v25 = vpop.f32.mrf.mxu3 }
 0x193   :  { %v308_v26 = vmul.f32 0.35355338, %v123_v25 }
 0x195   :  { %v316_v27 = vsel %vm101_vm1, %v308_v26, -inf }
 0x196   :  { %317 = vmax.xlane.f32.xlu2 %v316_v27 }
 0x1df   :  { %v201_v28 = vpop.f32.mrf.mxu1 }
 0x1e0   :  { %v311_v29 = vmul.f32 0.35355338, %v201_v28 }
 0x1e2   :  { %v325_v30 = vsel %vm101_vm1, %v311_v29, -inf }
 0x1e3   :  { %326 = vmax.xlane.f32.xlu0 %v325_v30 }
 0x1f5   :  { %v149_v31 = vpop.f32.mrf.mxu2 }
 0x1f6   :  { %v309_v32 = vmul.f32 0.35355338, %v149_v31  ;;  %v2165_v31 = vpack.i.bf16 %v2465_v17, %v2433_v10 }
 0x1f8   :  { %v319_v33 = vsel %vm101_vm1, %v309_v32, -inf }
 0x1f9   :  { %320 = vmax.xlane.f32.xlu1 %v319_v33 }
 0x1fd   :  { %v175_v34 = vpop.f32.mrf.mxu3  ;;  %v227_v43 = vpop.f32.mrf.mxu2 }
 0x1fe   :  { %v310_v35 = vmul.f32 0.35355338, %v175_v34  ;;  %v312_v46 = vmul.f32 0.35355338, %v227_v43 }
 0x1ff   :  { %v279_v37 = vpop.f32.mrf.mxu1 }
 0x200   :  { %v322_v36 = vsel %vm101_vm1, %v310_v35, -inf  ;;  %v2499_v38 = vmul.f32 0.35355338, %v279_v37  ;;  %v328_v48 = vsel %vm101_vm1, %v312_v46, -inf }
 0x201   :  { %323 = vmax.xlane.f32.xlu2 %v322_v36 }
 0x202   :  { %v334_v41 = vsel %vm101_vm1, %v2499_v38, -inf }
 0x205   :  { %v253_v39 = vpop.f32.mrf.mxu3 }
 0x206   :  { %v313_v40 = vmul.f32 0.35355338, %v253_v39  ;;  %v305_v51 = vpop.f32.mrf.mxu2 }
 0x207   :  { %v315_v52 = vmul.f32 0.35355338, %v305_v51 }
 0x208   :  { %v331_v42 = vsel %vm101_vm1, %v313_v40, -inf }
 0x209   :  { %v318_v44 = vpop.xlane.xlu2 %317  ;;  %335 = vmax.xlane.f32.xlu2 %v334_v41  ;;  %332 = vmax.xlane.f32.xlu1 %v331_v42  ;;  %v337_v53 = vsel %vm101_vm1, %v315_v52, -inf }
 0x20a   :  { %v340_v45 = vsub.f32 %v308_v26, %v318_v44 }
 0x20c   :  { %v348_v47 = vmul.f32 1.442695, %v340_v45 }
 0x20e   :  { %2211 = vpow2.f32 %v348_v47 }
 0x211   :  { %329 = vmax.xlane.f32.xlu2 %v328_v48 }
 0x214   :  { %v2212_v49 = vpop.eup %2211 }
 0x215   :  { %v364_v50 = vsel %vm101_vm1, %v2212_v49, 0.0 }
 0x216   :  { %365 = vadd.xlane.f32.xlu0 %v364_v50 }
 0x21e   :  { %338 = vmax.xlane.f32.xlu0 %v337_v53 }
 0x229   :  { %2156 = vrot.lane.b32.xlu2 %v2155_v54, %s2323_s25 }
 0x256   :  { %v327_v55 = vpop.xlane.xlu0 %326 }
 0x257   :  { %v343_v56 = vsub.f32 %v311_v29, %v327_v55 }
 0x259   :  { %v354_v57 = vmul.f32 1.442695, %v343_v56 }
 0x25b   :  { %2213 = vpow2.f32 %v354_v57 }
 0x261   :  { %v2510_v58 = vpop.eup %2213 }
 0x262   :  { %v373_v59 = vsel %vm101_vm1, %v2510_v58, 0.0 }
 0x263   :  { %374 = vadd.xlane.f32.xlu1 %v373_v59 }
 0x26c   :  { %v321_v60 = vpop.xlane.xlu1 %320 }
 0x26d   :  { %v341_v61 = vsub.f32 %v309_v32, %v321_v60  ;;  %v2160_v32 = vpack.i.bf16 %v2455_v13, %v2451_v12  ;;  %v2170_v12 = vpack.i.bf16 %v2463_v15, %v2447_v11  ;;  %v612_v11 = vld [vmem:[%s2972_s3] sm:$0xff]  ;;  %v615_v60 = vld [vmem:[%s2972_s3 + $0x18] sm:$0xff] }
 0x26f   :  { %v350_v62 = vmul.f32 1.442695, %v341_v61 }
 0x271   :  { %2215 = vpow2.f32 %v350_v62 }
 0x274   :  { %v324_v63 = vpop.xlane.xlu2 %323 }
 0x275   :  { %v342_v0 = vsub.f32 %v310_v35, %v324_v63 }
 0x277   :  { %v2514_v1 = vpop.eup %2215  ;;  %v352_v2 = vmul.f32 1.442695, %v342_v0 }
 0x278   :  { %v367_v3 = vsel %vm101_vm1, %v2514_v1, 0.0 }
 0x279   :  { %2217 = vpow2.f32 %v352_v2  ;;  %368 = vadd.xlane.f32.xlu0 %v367_v3 }
 0x27c   :  { %v336_v6 = vpop.xlane.xlu2 %335  ;;  %v333_v7 = vpop.xlane.xlu1 %332 }
 0x27d   :  { %v345_v8 = vsub.f32 %v313_v40, %v333_v7  ;;  %v346_v36 = vsub.f32 %v2499_v38, %v336_v6 }
 0x27f   :  { %v2518_v9 = vpop.eup %2217  ;;  %v358_v14 = vmul.f32 1.442695, %v345_v8  ;;  %v360_v39 = vmul.f32 1.442695, %v346_v36 }
 0x280   :  { %v370_v16 = vsel %vm101_vm1, %v2518_v9, 0.0 }
 0x281   :  { %371 = vadd.xlane.f32.xlu1 %v370_v16  ;;  %2219 = vpow2.f32 %v358_v14  ;;  %v614_v14 = vld [vmem:[%s2972_s3 + $0x10] sm:$0xff] }
 0x284   :  { %v330_v18 = vpop.xlane.xlu2 %329 }
 0x285   :  { %v344_v19 = vsub.f32 %v312_v46, %v330_v18 }
 0x287   :  { %v356_v20 = vmul.f32 1.442695, %v344_v19  ;;  %v2522_v21 = vpop.eup %2219 }
 0x288   :  { %v379_v22 = vsel %vm101_vm1, %v2522_v21, 0.0 }
 0x289   :  { %2221 = vpow2.f32 %v356_v20  ;;  %v366_v23 = vpop.xlane.xlu0 %365  ;;  %380 = vadd.xlane.f32.xlu2 %v379_v22 }
 0x28a   :  { %2223 = vrcp.f32 %v366_v23 }
 0x28c   :  { %v2157_v24 = vpop.permute.xlu2 %2156 }
 0x28d   :  { %v2159_v25 = vunpack.i.h.bf16 %v2157_v24  ;;  %v2158_v26 = vunpack.i.l.bf16 %v2157_v24 }
 0x28f   :  { %v2222_v27 = vpop.eup %2221  ;;  %425 = vmatpush.msrb.mxu3 %v2158_v26  ;;  %503 = vmatpush.msrb.mxu2 %v2159_v25 }
 0x290   :  { %v2224_v28 = vpop.eup %2223  ;;  %v376_v29 = vsel %vm101_vm1, %v2222_v27, 0.0 }
 0x291   :  { %v396_v30 = vmul.f32 %v2224_v28, %v2212_v49  ;;  %377 = vadd.xlane.f32.xlu0 %v376_v29  ;;  %v339_v33 = vpop.xlane.xlu0 %338 }
 0x292   :  { %v347_v34 = vsub.f32 %v315_v52, %v339_v33 }
 0x293   :  { %2052 = vmatmul.msk.f32.vlgmr.msrb.gmra.mxu3 %vm101_vm1, %v396_v30 }
 0x294   :  { %v362_v35 = vmul.f32 1.442695, %v347_v34 }
 0x296   :  { %2225 = vpow2.f32 %v362_v35 }
 0x297   :  { %2227 = vpow2.f32 %v360_v39 }
 0x29a   :  { %2166 = vrot.lane.b32.xlu1 %v2165_v31, %s2323_s25 }
 0x29c   :  { %v2226_v37 = vpop.eup %2225 }
 0x29d   :  { %v385_v40 = vsel %vm101_vm1, %v2226_v37, 0.0  ;;  %v2228_v10 = vpop.eup %2227 }
 0x29e   :  { %v382_v17 = vsel %vm101_vm1, %v2228_v10, 0.0 }
 0x2a5   :  { %2161 = vrot.lane.b32.xlu0 %v2160_v32, %s2323_s25  ;;  %v2196_v32 = vld [vmem:[%s2973_s4] ss:$0 sm:$0xff] }
 0x2c4   :  { %386 = vadd.xlane.f32.xlu1 %v385_v40 }
 0x2cf   :  { %383 = vadd.xlane.f32.xlu0 %v382_v17 }
 0x2d6   :  { %v375_v41 = vpop.xlane.xlu1 %374 }
 0x2d7   :  { %2229 = vrcp.f32 %v375_v41 }
 0x2dd   :  { %v2230_v13 = vpop.eup %2229  ;;  %2171 = vrot.lane.b32.xlu1 %v2170_v12, %s2323_s25 }
 0x2de   :  { %v399_v38 = vmul.f32 %v2230_v13, %v2510_v58 }
 0x2e0   :  { %2055 = vmatmul.msk.f32.vlgmr.msrb.gmra.mxu2 %vm101_vm1, %v399_v38 }
 0x2ec   :  { %v369_v42 = vpop.xlane.xlu0 %368 }
 0x2f4   :  { %v372_v43 = vpop.xlane.xlu1 %371 }
 0x2fc   :  { %v381_v61 = vpop.xlane.xlu2 %380 }
 0x304   :  { %v378_v44 = vpop.xlane.xlu0 %377 }
 0x305   :  { %2231 = vrcp.f32 %v378_v44 }
 0x306   :  { %2233 = vrcp.f32 %v369_v42 }
 0x307   :  { %2235 = vrcp.f32 %v372_v43 }
 0x30b   :  { %v2232_v45 = vpop.eup %2231 }
 0x30c   :  { %v2167_v46 = vpop.permute.xlu1 %2166  ;;  %v400_v49 = vmul.f32 %v2232_v45, %v2222_v27  ;;  %v2234_v15 = vpop.eup %2233 }
 0x30d   :  { %v2169_v47 = vunpack.i.h.bf16 %v2167_v46  ;;  %v2168_v48 = vunpack.i.l.bf16 %v2167_v46  ;;  %v2236_v50 = vpop.eup %2235  ;;  %v397_v56 = vmul.f32 %v2234_v15, %v2514_v1 }
 0x30e   :  { %v398_v55 = vmul.f32 %v2236_v50, %v2518_v9  ;;  %v613_v9 = vld [vmem:[%s2972_s3 + $0x8] sm:$0xff] }
 0x30f   :  { %529 = vmatpush.msra.mxu3 %v2168_v48  ;;  %607 = vmatpush.msra.mxu2 %v2169_v47  ;;  %v2324_v47 = vmov 32.0  }
 0x310   :  { %2056 = vmatmul.msk.f32.vlgmr.msra.gmra.mxu3 %vm101_vm1, %v400_v49 }
 0x311   :  { %634 = vmatpush.msrb.mxu3 %v612_v11  ;;  %703 = vmatpush.msrb.mxu2 %v615_v60 }
 0x313   :  { %737 = vmatpush.msra.mxu3 %v612_v11 }
 0x316   :  { %v427_v51 = vpop.f32.mrf.mxu3 }
 0x317   :  { %v2162_v52 = vpop.permute.xlu0 %2161 }
 0x318   :  { %v2164_v53 = vunpack.i.h.bf16 %v2162_v52  ;;  %2060 = vmatmul.msk.f32.vlgmr.msrb.gmra.mxu3 %vm101_vm1, %v427_v51  ;;  %v2163_v54 = vunpack.i.l.bf16 %v2162_v52 }
 0x31a   :  { %451 = vmatpush.msrb.mxu0 %v2163_v54  ;;  %477 = vmatpush.msra.mxu1 %v2164_v53 }
 0x31b   :  { %2053 = vmatmul.msk.f32.vlgmr.msrb.gmra.mxu0 %vm101_vm1, %v397_v56  ;;  %2054 = vmatmul.msk.f32.vlgmr.msra.gmra.mxu1 %vm101_vm1, %v398_v55 }
 0x337   :  { %v387_v57 = vpop.xlane.xlu1 %386 }
 0x338   :  { %2237 = vrcp.f32 %v387_v57 }
 0x339   :  { %2239 = vrcp.f32 %v381_v61  ;;  %v892_v61 = vld [vmem:[%s2974_s5 + $0x18] sm:$0xff] }
 0x33a   :  { %915 = vmatpush.msrb.mxu3 %v892_v61 }
 0x33e   :  { %v2238_v58 = vpop.eup %2237 }
 0x33f   :  { %v403_v59 = vmul.f32 %v2238_v58, %v2226_v37  ;;  %v2240_v63 = vpop.eup %2239 }
 0x340   :  { %v401_v6 = vmul.f32 %v2240_v63, %v2522_v21  ;;  %v890_v63 = vld [vmem:[%s2974_s5 + $0x8] sm:$0xff] }
 0x341   :  { %2059 = vmatmul.msk.f32.vlgmr.msra.gmra.mxu2 %vm101_vm1, %v403_v59 }
 0x342   :  { %v384_v62 = vpop.xlane.xlu0 %383  ;;  %806 = vmatpush.msra.mxu2 %v615_v60 }
 0x343   :  { %2241 = vrcp.f32 %v384_v62  ;;  %v891_v62 = vld [vmem:[%s2974_s5 + $0x10] sm:$0xff] }
 0x344   :  { %2243 = vrcp.f32 %v2324_v47  ;;  %916 = vmatpush.msrb.mxu3 %v891_v62  ;;  %v928_v47 = vld [vmem:[%s2976_s7] sm:$0xff] }
 0x346   :  { %917 = vmatpush.msrb.mxu3 %v890_v63 }
 0x349   :  { %v2242_v0 = vpop.eup %2241 }
 0x34a   :  { %v402_v7 = vmul.f32 %v2242_v0, %v2228_v10  ;;  %v2244_v48 = vpop.eup %2243  ;;  %v889_v0 = vld [vmem:[%s2974_s5] sm:$0xff] }
 0x34b   :  { %v833_v49 = vmul.f32 32.0, %v2244_v48  ;;  %vm837_vm2 = vweird.f32 %v2244_v48  ;;  %918 = vmatpush.msrb.mxu3 %v889_v0 }
 0x34d   :  { %v834_v11 = vsub.f32 1.0, %v833_v49 }
 0x34f   :  { %v2172_v1 = vpop.permute.xlu1 %2171  ;;  %v835_v15 = vmul.f32 %v2244_v48, %v834_v11 }
 0x350   :  { %v2174_v2 = vunpack.i.h.bf16 %v2172_v1  ;;  %v2173_v3 = vunpack.i.l.bf16 %v2172_v1 }
 0x351   :  { %v836_v50 = vadd.f32 %v2244_v48, %v835_v15 }
 0x352   :  { %555 = vmatpush.msra.mxu0 %v2173_v3  ;;  %581 = vmatpush.msrb.mxu1 %v2174_v2 }
 0x353   :  { %2057 = vmatmul.msk.f32.vlgmr.msra.gmra.mxu0 %vm101_vm1, %v401_v6  ;;  %2058 = vmatmul.msk.f32.vlgmr.msrb.gmra.mxu1 %vm101_vm1, %v402_v7  ;;  %v2586_v51 = vsel %vm837_vm2, %v2244_v48, %v836_v50  ;;  %v2199_v48 = vld [vmem:[%s2975_s6] ss:$0 sm:$0xff] }
 0x354   :  { %657 = vmatpush.msrb.mxu0 %v613_v9  ;;  %680 = vmatpush.msra.mxu1 %v614_v14 }
 0x356   :  { %760 = vmatpush.msra.mxu0 %v613_v9  ;;  %783 = vmatpush.msrb.mxu1 %v614_v14 }
 0x363   :  { %v505_v8 = vpop.f32.mrf.mxu2 }
 0x364   :  { %2063 = vmatmul.msk.f32.vlgmr.msrb.gmra.mxu2 %vm101_vm1, %v505_v8 }
 0x393   :  { %v531_v16 = vpop.f32.mrf.mxu3 }
 0x394   :  { %2064 = vmatmul.msk.f32.vlgmr.msra.gmra.mxu3 %vm101_vm1, %v531_v16 }
 0x398   :  { %v453_v18 = vpop.f32.mrf.mxu0  ;;  %v479_v19 = vpop.f32.mrf.mxu1 }
 0x399   :  { %2061 = vmatmul.msk.f32.vlgmr.msrb.gmra.mxu0 %vm101_vm1, %v453_v18  ;;  %2062 = vmatmul.msk.f32.vlgmr.msra.gmra.mxu1 %vm101_vm1, %v479_v19  ;;  %v2197_v18 = vld [vmem:[%s2978_s9] ss:$0 sm:$0xff] }
 0x39b   :  { %v636_v23 = vpop.f32.mrf.mxu3 }
 0x39c   :  { %v708_v26 = vsel %vm55_vm0, %v636_v23, 0.0 }
 0x3c4   :  { %v609_v20 = vpop.f32.mrf.mxu2 }
 0x3c5   :  { %2067 = vmatmul.msk.f32.vlgmr.msra.gmra.mxu2 %vm101_vm1, %v609_v20 }
 0x3d0   :  { %v557_v21 = vpop.f32.mrf.mxu0  ;;  %v583_v22 = vpop.f32.mrf.mxu1 }
 0x3d1   :  { %2065 = vmatmul.msk.f32.vlgmr.msra.gmra.mxu0 %vm101_vm1, %v557_v21  ;;  %2066 = vmatmul.msk.f32.vlgmr.msrb.gmra.mxu1 %vm101_vm1, %v583_v22  ;;  %v2198_v21 = vld [vmem:[%s2979_s10] ss:$0 sm:$0xff] }
 0x3e7   :  { %v705_v28 = vpop.f32.mrf.mxu2 }
 0x3e8   :  { %v713_v33 = vsel %vm55_vm0, %v705_v28, 0.0 }
 0x416   :  { %v659_v24 = vpop.f32.mrf.mxu0  ;;  %v682_v25 = vpop.f32.mrf.mxu1 }
 0x417   :  { %v709_v27 = vsel %vm55_vm0, %v659_v24, 0.0  ;;  %v711_v30 = vsel %vm55_vm0, %v682_v25, 0.0  ;;  %v739_v39 = vpop.f32.mrf.mxu3  ;;  %v943_v24 = vld [vmem:[%s2976_s7 + $0x78] sm:$0xff]  ;;  %v942_v25 = vld [vmem:[%s2976_s7 + $0x70] sm:$0xff] }
 0x418   :  { %v710_v29 = vadd.f32 %v709_v27, %v708_v26  ;;  %v811_v17 = vsel %vm55_vm0, %v739_v39, 0.0  ;;  %948 = vmatpush.msrb.mxu0 %v943_v24  ;;  %v941_v26 = vld [vmem:[%s2976_s7 + $0x68] sm:$0xff]  ;;  %v934_v39 = vld [vmem:[%s2976_s7 + $0x30] sm:$0xff] }
 0x41a   :  { %v712_v31 = vadd.f32 %v711_v30, %v710_v29  ;;  %949 = vmatpush.msrb.mxu0 %v942_v25  ;;  %v940_v29 = vld [vmem:[%s2976_s7 + $0x60] sm:$0xff] }
 0x41c   :  { %v714_v34 = vadd.f32 %v713_v33, %v712_v31  ;;  %950 = vmatpush.msrb.mxu0 %v941_v26  ;;  %v939_v31 = vld [vmem:[%s2976_s7 + $0x58] sm:$0xff]  ;;  %v937_v33 = vld [vmem:[%s2976_s7 + $0x48] sm:$0xff] }
 0x41e   :  { %v822_v35 = vadd.f32 %v2196_v32, %v714_v34  ;;  %951 = vmatpush.msrb.mxu0 %v940_v29  ;;  %v936_v34 = vld [vmem:[%s2976_s7 + $0x40] sm:$0xff] }
 0x41f   :  { %v2201_v29 = vld [vmem:[%s2980_s11] ss:$0 sm:$0xff] }
 0x420   :  { %v824_v36 = vadd.f32 %v822_v35, %v2413_v4  ;;  %952 = vmatpush.msrb.mxu0 %v939_v31 }
 0x422   :  { %v826_v37 = vsel %vm55_vm0, %v824_v36, 0.0 }
 0x423   :  { %827 = vadd.xlane.f32.xlu1 %v826_v37 }
 0x448   :  { %v808_v12 = vpop.f32.mrf.mxu2 }
 0x449   :  { %v816_v43 = vsel %vm55_vm0, %v808_v12, 0.0 }
 0x44e   :  { %v762_v40 = vpop.f32.mrf.mxu0  ;;  %v785_v10 = vpop.f32.mrf.mxu1 }
 0x44f   :  { %v812_v41 = vsel %vm55_vm0, %v762_v40, 0.0  ;;  %v814_v38 = vsel %vm55_vm0, %v785_v10, 0.0  ;;  %v933_v10 = vld [vmem:[%s2976_s7 + $0x28] sm:$0xff] }
 0x450   :  { %v813_v13 = vadd.f32 %v812_v41, %v811_v17  ;;  %v932_v41 = vld [vmem:[%s2976_s7 + $0x20] sm:$0xff] }
 0x452   :  { %v815_v42 = vadd.f32 %v814_v38, %v813_v13  ;;  %v931_v13 = vld [vmem:[%s2976_s7 + $0x18] sm:$0xff] }
 0x454   :  { %v817_v44 = vadd.f32 %v816_v43, %v815_v42 }
 0x456   :  { %v823_v45 = vadd.f32 %v2196_v32, %v817_v44  ;;  %v938_v32 = vld [vmem:[%s2976_s7 + $0x50] sm:$0xff] }
 0x457   :  { %953 = vmatpush.msrb.mxu0 %v938_v32  ;;  %v2202_v32 = vld [vmem:[%s2981_s12] ss:$0 sm:$0xff] }
 0x458   :  { %v825_v4 = vadd.f32 %v823_v45, %v2420_v5 }
 0x459   :  { %954 = vmatpush.msrb.mxu0 %v937_v33 }
 0x45a   :  { %v829_v46 = vsel %vm55_vm0, %v825_v4, 0.0 }
 0x45b   :  { %830 = vadd.xlane.f32.xlu2 %v829_v46  ;;  %955 = vmatpush.msrb.mxu0 %v936_v34  ;;  %v929_v46 = vld [vmem:[%s2976_s7 + $0x8] sm:$0xff] }
 0x496   :  { %v828_v52 = vpop.xlane.xlu1 %827 }
 0x497   :  { %v839_v53 = vmul.f32 %v2586_v51, %v828_v52 }
 0x499   :  { %v841_v54 = vsub.f32 %v824_v36, %v839_v53  ;;  %v935_v36 = vld [vmem:[%s2976_s7 + $0x38] sm:$0xff] }
 0x49a   :  { %956 = vmatpush.msrb.mxu0 %v935_v36 }
 0x49b   :  { %v843_v55 = vmul.f32 %v841_v54, %v841_v54 }
 0x49c   :  { %957 = vmatpush.msrb.mxu0 %v934_v39 }
 0x49d   :  { %v845_v5 = vsel %vm55_vm0, %v843_v55, 0.0 }
 0x49e   :  { %846 = vadd.xlane.f32.xlu2 %v845_v5  ;;  %958 = vmatpush.msrb.mxu0 %v933_v10 }
 0x4a0   :  { %959 = vmatpush.msrb.mxu0 %v932_v41 }
 0x4a2   :  { %960 = vmatpush.msrb.mxu0 %v931_v13 }
 0x4ce   :  { %v831_v56 = vpop.xlane.xlu2 %830 }
 0x4cf   :  { %v840_v57 = vmul.f32 %v2586_v51, %v831_v56 }
 0x4d1   :  { %v2591_v58 = vsub.f32 %v825_v4, %v840_v57  ;;  %v930_v4 = vld [vmem:[%s2976_s7 + $0x10] sm:$0xff] }
 0x4d2   :  { %961 = vmatpush.msrb.mxu0 %v930_v4 }
 0x4d3   :  { %v844_v59 = vmul.f32 %v2591_v58, %v2591_v58 }
 0x4d4   :  { %962 = vmatpush.msrb.mxu0 %v929_v46 }
 0x4d5   :  { %v848_v60 = vsel %vm55_vm0, %v844_v59, 0.0 }
 0x4d6   :  { %849 = vadd.xlane.f32.xlu0 %v848_v60  ;;  %963 = vmatpush.msrb.mxu0 %v928_v47 }
 0x511   :  { %v847_v1 = vpop.xlane.xlu2 %846 }
 0x512   :  { %v851_v2 = vmul.f32 %v847_v1, %v2586_v51 }
 0x514   :  { %v853_v3 = vadd.f32 1e-05, %v851_v2 }
 0x516   :  { %2245 = vrsqrt.f32 %v853_v3  ;;  %vm861_vm4 = vweird.f32 %v853_v3 }
 0x51c   :  { %v2246_v6 = vpop.eup %2245 }
 0x51d   :  { %v856_v7 = vmul.f32 %v2246_v6, %v853_v3  ;;  %vm862_vm3 = vweird.f32 %v2246_v6 }
 0x51e   :  { %vm863_vm5 = vmor %vm861_vm4, %vm862_vm3 }
 0x51f   :  { %v857_v8 = vmul.f32 %v2246_v6, %v856_v7 }
 0x521   :  { %v858_v9 = vmul.f32 0.5, %v857_v8 }
 0x523   :  { %v859_v14 = vsub.f32 1.5, %v858_v9 }
 0x525   :  { %v860_v16 = vmul.f32 %v2246_v6, %v859_v14  ;;  %v2073_v14 = vld [vmem:[%s2970_s1 + $0x38] sm:$0xff] }
 0x526   :  { %1057 = vmatpush.msrb.mxu2 %v2073_v14 }
 0x527   :  { %v864_v19 = vsel %vm863_vm5, %v2246_v6, %v860_v16  ;;  %v2072_v16 = vld [vmem:[%s2970_s1 + $0x30] sm:$0xff] }
 0x528   :  { %v875_v20 = vmul.f32 %v864_v19, %v841_v54  ;;  %v2200_v54 = vld [vmem:[%s2977_s8] ss:$0 sm:$0xff]  ;;  %1058 = vmatpush.msrb.mxu2 %v2072_v16 }
 0x529   :  { %v2070_v19 = vld [vmem:[%s2970_s1 + $0x20] sm:$0xff] }
 0x52a   :  { %v881_v22 = vmul.f32 %v2197_v18, %v875_v20 }
 0x52c   :  { %v2615_v23 = vadd.f32 %v2198_v21, %v881_v22 }
 0x52e   :  { %2068 = vmatmul.msk.f32.vlgmr.msrb.gmra.mxu3 %vm55_vm0, %v2615_v23 }
 0x549   :  { %v850_v27 = vpop.xlane.xlu0 %849 }
 0x54a   :  { %v852_v28 = vmul.f32 %v850_v27, %v2586_v51 }
 0x54c   :  { %v854_v30 = vadd.f32 1e-05, %v852_v28 }
 0x54e   :  { %2247 = vrsqrt.f32 %v854_v30  ;;  %vm871_vm7 = vweird.f32 %v854_v30 }
 0x554   :  { %v2248_v35 = vpop.eup %2247 }
 0x555   :  { %v866_v37 = vmul.f32 %v2248_v35, %v854_v30  ;;  %vm872_vm6 = vweird.f32 %v2248_v35 }
 0x556   :  { %vm873_vm8 = vmor %vm871_vm7, %vm872_vm6 }
 0x557   :  { %v867_v40 = vmul.f32 %v2248_v35, %v866_v37 }
 0x559   :  { %v868_v17 = vmul.f32 0.5, %v867_v40 }
 0x55b   :  { %v869_v12 = vsub.f32 1.5, %v868_v17 }
 0x55d   :  { %v870_v38 = vmul.f32 %v2248_v35, %v869_v12 }
 0x55f   :  { %v874_v42 = vsel %vm873_vm8, %v2248_v35, %v870_v38 }
 0x560   :  { %v876_v43 = vmul.f32 %v874_v42, %v2591_v58 }
 0x562   :  { %v882_v44 = vmul.f32 %v2197_v18, %v876_v43  ;;  %v2071_v18 = vld [vmem:[%s2970_s1 + $0x28] sm:$0xff] }
 0x563   :  { %1059 = vmatpush.msrb.mxu2 %v2071_v18 }
 0x564   :  { %v888_v45 = vadd.f32 %v2198_v21, %v882_v44  ;;  %v2203_v44 = vld [vmem:[%s2971_s2 + $0x1] ss:$0 sm:$0xff] }
 0x565   :  { %1060 = vmatpush.msrb.mxu2 %v2070_v19 }
 0x566   :  { %2069 = vmatmul.msk.f32.gmra.mxu3 %vm55_vm0, %v888_v45 }
 0x5b1   :  { %v920_v49 = vpop.f32.mrf.mxu3 }
 0x5b2   :  { %v921_v11 = vadd.f32 %v2199_v48, %v920_v49 }
 0x5b4   :  { %v926_v15 = vmax.f32 %v921_v11, 0.0 }
 0x5b6   :  { %964 = vmatmul.f32.vlgmr.msrb.gmra.mxu0 %v926_v15 }
 0x5e9   :  { %v923_v50 = vpop.f32.mrf.mxu3 }
 0x5ea   :  { %v924_v52 = vadd.f32 %v2199_v48, %v923_v50 }
 0x5ec   :  { %v927_v53 = vmax.f32 %v924_v52, 0.0 }
 0x5ee   :  { %967 = vmatmul.f32.gmra.mxu0 %v927_v53 }
 0x633   :  { %v965_v55 = vpop.f32.mrf.mxu0 }
 0x634   :  { %v966_v5 = vadd.f32 %v2200_v54, %v965_v55 }
 0x636   :  { %v971_v56 = vadd.f32 %v966_v5, %v2615_v23 }
 0x638   :  { %v973_v57 = vsel %vm55_vm0, %v971_v56, 0.0 }
 0x639   :  { %974 = vadd.xlane.f32.xlu2 %v973_v57 }
 0x66b   :  { %v968_v58 = vpop.f32.mrf.mxu0 }
 0x66c   :  { %v969_v59 = vadd.f32 %v2200_v54, %v968_v58 }
 0x66e   :  { %v972_v60 = vadd.f32 %v969_v59, %v888_v45 }
 0x670   :  { %v976_v61 = vsel %vm55_vm0, %v972_v60, 0.0 }
 0x671   :  { %977 = vadd.xlane.f32.xlu0 %v976_v61 }
 0x6ac   :  { %v975_v62 = vpop.xlane.xlu2 %974 }
 0x6ad   :  { %v979_v63 = vmul.f32 %v975_v62, %v2586_v51 }
 0x6af   :  { %v981_v0 = vsub.f32 %v971_v56, %v979_v63 }
 0x6b1   :  { %v983_v1 = vmul.f32 %v981_v0, %v981_v0 }
 0x6b3   :  { %v985_v2 = vsel %vm55_vm0, %v983_v1, 0.0 }
 0x6b4   :  { %986 = vadd.xlane.f32.xlu2 %v985_v2 }
 0x6e4   :  { %v978_v3 = vpop.xlane.xlu0 %977 }
 0x6e5   :  { %v980_v6 = vmul.f32 %v978_v3, %v2586_v51 }
 0x6e7   :  { %v982_v7 = vsub.f32 %v972_v60, %v980_v6 }
 0x6e9   :  { %v984_v8 = vmul.f32 %v982_v7, %v982_v7 }
 0x6eb   :  { %v988_v9 = vsel %vm55_vm0, %v984_v8, 0.0 }
 0x6ec   :  { %989 = vadd.xlane.f32.xlu1 %v988_v9 }
 0x727   :  { %v987_v20 = vpop.xlane.xlu2 %986 }
 0x728   :  { %v991_v21 = vmul.f32 %v987_v20, %v2586_v51 }
 0x72a   :  { %v993_v22 = vadd.f32 1e-05, %v991_v21 }
 0x72c   :  { %2249 = vrsqrt.f32 %v993_v22  ;;  %vm1001_vm10 = vweird.f32 %v993_v22 }
 0x732   :  { %v2250_v23 = vpop.eup %2249 }
 0x733   :  { %v996_v24 = vmul.f32 %v2250_v23, %v993_v22  ;;  %vm1002_vm9 = vweird.f32 %v2250_v23 }
 0x734   :  { %vm1003_vm11 = vmor %vm1001_vm10, %vm1002_vm9 }
 0x735   :  { %v997_v25 = vmul.f32 %v2250_v23, %v996_v24 }
 0x737   :  { %v998_v26 = vmul.f32 0.5, %v997_v25 }
 0x739   :  { %v999_v27 = vsub.f32 1.5, %v998_v26 }
 0x73b   :  { %v1000_v28 = vmul.f32 %v2250_v23, %v999_v27 }
 0x73d   :  { %v1004_v30 = vsel %vm1003_vm11, %v2250_v23, %v1000_v28 }
 0x73e   :  { %v1015_v31 = vmul.f32 %v1004_v30, %v981_v0 }
 0x740   :  { %v1021_v33 = vmul.f32 %v2201_v29, %v1015_v31 }
 0x742   :  { %v2702_v34 = vadd.f32 %v2202_v32, %v1021_v33 }
 0x744   :  { %2075 = vmatmul.msk.f32.vlgmr.msrb.gmra.mxu2 %vm55_vm0, %v2702_v34 }
 0x75f   :  { %v990_v35 = vpop.xlane.xlu1 %989 }
 0x760   :  { %v992_v36 = vmul.f32 %v990_v35, %v2586_v51 }
 0x762   :  { %v994_v37 = vadd.f32 1e-05, %v992_v36 }
 0x764   :  { %2251 = vrsqrt.f32 %v994_v37  ;;  %vm1011_vm13 = vweird.f32 %v994_v37 }
 0x76a   :  { %v2252_v39 = vpop.eup %2251 }
 0x76b   :  { %v1006_v40 = vmul.f32 %v2252_v39, %v994_v37  ;;  %vm1012_vm12 = vweird.f32 %v2252_v39 }
 0x76c   :  { %vm1013_vm14 = vmor %vm1011_vm13, %vm1012_vm12 }
 0x76d   :  { %v1007_v10 = vmul.f32 %v2252_v39, %v1006_v40 }
 0x76f   :  { %v1008_v17 = vmul.f32 0.5, %v1007_v10 }
 0x771   :  { %v1009_v41 = vsub.f32 1.5, %v1008_v17 }
 0x773   :  { %v1010_v12 = vmul.f32 %v2252_v39, %v1009_v41 }
 0x775   :  { %v1014_v13 = vsel %vm1013_vm14, %v2252_v39, %v1010_v12 }
 0x776   :  { %v1016_v38 = vmul.f32 %v1014_v13, %v982_v7 }
 0x778   :  { %v1022_v42 = vmul.f32 %v2201_v29, %v1016_v38 }
 0x77a   :  { %v2707_v43 = vadd.f32 %v2202_v32, %v1022_v42 }
 0x77c   :  { %2076 = vmatmul.msk.f32.gmra.mxu2 %vm55_vm0, %v2707_v43 }
 0x7c7   :  { %v1062_v45 = vpop.f32.mrf.mxu2 }
 0x7c8   :  { %v2714_v4 = vadd.f32 %v2203_v44, %v1062_v45 }
 0x7ca   :  { %1073 = vrot.lane.b32.xlu1 %v2714_v4, %s2321_s0  ;;  %1071 = vrot.lane.b32.xlu2 %v2714_v4, %s2319_s22 }
 0x7cb   :  { %1069 = vrot.lane.b32.xlu0 %v2714_v4, %s2320_s23 }
 0x7d2   :  { %1082 = vrot.lane.b32.xlu1 %v2714_v4, %s2322_s24 }
 0x7ff   :  { %v1065_v46 = vpop.f32.mrf.mxu2 }
 0x800   :  { %v2724_v47 = vadd.f32 %v2203_v44, %v1065_v46 }
 0x802   :  { %1186 = vrot.lane.b32.xlu1 %v2724_v47, %s2322_s24  ;;  %1078 = vrot.lane.b32.xlu2 %v2724_v47, %s2319_s22 }
 0x803   :  { %1080 = vrot.lane.b32.xlu0 %v2724_v47, %s2321_s0 }
 0x80b   :  { %1076 = vrot.lane.b32.xlu0 %v2724_v47, %s2320_s23 }
 0x824   :  { %v2734_v48 = vpop.permute.xlu2 %1071 }
 0x825   :  { %1134 = vrot.lane.b32.xlu0 %v2734_v48, %s2322_s24  ;;  %v2175_v35 = vpack.i.bf16 %v2734_v48, %v2714_v4 }
 0x83c   :  { %v2738_v49 = vpop.permute.xlu1 %1073 }
 0x83d   :  { %v2740_v11 = vpop.permute.xlu0 %1069 }
 0x83e   :  { %1108 = vrot.lane.b32.xlu2 %v2740_v11, %s2322_s24 }
 0x844   :  { %v1083_v15 = vpop.permute.xlu1 %1082 }
 0x845   :  { %2077 = vmatpush.xpose.msk.msra.mxu2 %vm101_vm1, %v1083_v15 }
 0x846   :  { %1160 = vrot.lane.b32.xlu2 %v2738_v49, %s2322_s24 }
 0x848   :  { %2078 = vmatmul.msk.f32.vlgmr.msra.gmra.mxu2 %vm101_vm1, %v2714_v4 }
 0x85c   :  { %v2749_v50 = vpop.permute.xlu2 %1078 }
 0x85d   :  { %1238 = vrot.lane.b32.xlu1 %v2749_v50, %s2322_s24  ;;  %v2180_v33 = vpack.i.bf16 %v2749_v50, %v2738_v49 }
 0x874   :  { %v1187_v5 = vpop.permute.xlu1 %1186 }
 0x875   :  { %v2753_v52 = vpop.permute.xlu0 %1080 }
 0x876   :  { %1264 = vrot.lane.b32.xlu0 %v2753_v52, %s2322_s24 }
 0x87d   :  { %v2757_v53 = vpop.permute.xlu0 %1076 }
 0x87e   :  { %1212 = vrot.lane.b32.xlu2 %v2757_v53, %s2322_s24 }
 0x897   :  { %v1135_v54 = vpop.permute.xlu0 %1134 }
 0x898   :  { %v1109_v55 = vpop.permute.xlu2 %1108  ;;  %2081 = vmatpush.xpose.msk.msra.mxu3 %vm101_vm1, %v1135_v54 }
 0x899   :  { %2079 = vmatpush.xpose.msk.msrb.mxu2 %vm101_vm1, %v1109_v55  ;;  %v2190_v55 = vpack.i.bf16 %v2757_v53, %v2724_v47 }
 0x89b   :  { %2082 = vmatmul.msk.f32.vlgmr.msra.gmra.mxu3 %vm101_vm1, %v2734_v48 }
 0x89c   :  { %2080 = vmatmul.msk.f32.vlgmr.msrb.gmra.mxu2 %vm101_vm1, %v2740_v11 }
 0x89d   :  { %2085 = vmatpush.xpose.msk.msra.mxu2 %vm101_vm1, %v1187_v5 }
 0x8a0   :  { %v1161_v56 = vpop.permute.xlu2 %1160 }
 0x8a1   :  { %2083 = vmatpush.xpose.msk.msra.mxu1 %vm101_vm1, %v1161_v56 }
 0x8a4   :  { %2084 = vmatmul.msk.f32.vlgmr.msra.gmra.mxu1 %vm101_vm1, %v2738_v49  ;;  %2086 = vmatmul.msk.f32.vlgmr.msra.gmra.mxu2 %vm101_vm1, %v2724_v47 }
 0x8cb   :  { %v1105_v57 = vpop.f32.mrf.mxu2 }
 0x8cc   :  { %v1290_v58 = vmul.f32 0.35355338, %v1105_v57 }
 0x8ce   :  { %v1298_v59 = vsel %vm101_vm1, %v1290_v58, -inf }
 0x8cf   :  { %v1239_v60 = vpop.permute.xlu1 %1238  ;;  %1299 = vmax.xlane.f32.xlu0 %v1298_v59 }
 0x8d0   :  { %2089 = vmatpush.xpose.msk.msrb.mxu1 %vm101_vm1, %v1239_v60 }
 0x8d3   :  { %2090 = vmatmul.msk.f32.vlgmr.msrb.gmra.mxu1 %vm101_vm1, %v2749_v50 }
 0x8d8   :  { %v1213_v61 = vpop.permute.xlu2 %1212 }
 0x8d9   :  { %2087 = vmatpush.xpose.msk.msrb.mxu3 %vm101_vm1, %v1213_v61 }
 0x8dc   :  { %2088 = vmatmul.msk.f32.vlgmr.msrb.gmra.mxu3 %vm101_vm1, %v2757_v53 }
 0x8e8   :  { %v1265_v62 = vpop.permute.xlu0 %1264 }
 0x8e9   :  { %2091 = vmatpush.xpose.msk.msrb.mxu2 %vm101_vm1, %v1265_v62 }
 0x8ec   :  { %2092 = vmatmul.msk.f32.vlgmr.msrb.gmra.mxu2 %vm101_vm1, %v2753_v52 }
 0x91e   :  { %v1157_v63 = vpop.f32.mrf.mxu3 }
 0x91f   :  { %v1131_v0 = vpop.f32.mrf.mxu2  ;;  %v1292_v1 = vmul.f32 0.35355338, %v1157_v63 }
 0x920   :  { %v1291_v8 = vmul.f32 0.35355338, %v1131_v0 }
 0x921   :  { %v1183_v2 = vpop.f32.mrf.mxu1  ;;  %v1304_v3 = vsel %vm101_vm1, %v1292_v1, -inf }
 0x922   :  { %v1293_v6 = vmul.f32 0.35355338, %v1183_v2  ;;  %1305 = vmax.xlane.f32.xlu1 %v1304_v3  ;;  %v1301_v16 = vsel %vm101_vm1, %v1291_v8, -inf }
 0x924   :  { %v1307_v7 = vsel %vm101_vm1, %v1293_v6, -inf }
 0x925   :  { %1308 = vmax.xlane.f32.xlu2 %v1307_v7 }
 0x927   :  { %v1209_v9 = vpop.f32.mrf.mxu2 }
 0x928   :  { %v1294_v14 = vmul.f32 0.35355338, %v1209_v9 }
 0x92a   :  { %v1310_v18 = vsel %vm101_vm1, %v1294_v14, -inf  ;;  %1302 = vmax.xlane.f32.xlu1 %v1301_v16 }
 0x92b   :  { %1311 = vmax.xlane.f32.xlu0 %v1310_v18 }
 0x942   :  { %v1300_v19 = vpop.xlane.xlu0 %1299 }
 0x943   :  { %v1322_v20 = vsub.f32 %v1290_v58, %v1300_v19 }
 0x945   :  { %v1330_v21 = vmul.f32 1.442695, %v1322_v20 }
 0x947   :  { %2253 = vpow2.f32 %v1330_v21  ;;  %v2185_v21 = vpack.i.bf16 %v2753_v52, %v2740_v11 }
 0x94d   :  { %v2787_v22 = vpop.eup %2253 }
 0x94e   :  { %v1346_v23 = vsel %vm101_vm1, %v2787_v22, 0.0 }
 0x94f   :  { %1347 = vadd.xlane.f32.xlu2 %v1346_v23 }
 0x950   :  { %v1261_v24 = vpop.f32.mrf.mxu1 }
 0x951   :  { %v1296_v25 = vmul.f32 0.35355338, %v1261_v24 }
 0x953   :  { %v1316_v26 = vsel %vm101_vm1, %v1296_v25, -inf }
 0x954   :  { %1317 = vmax.xlane.f32.xlu0 %v1316_v26 }
 0x95f   :  { %v1235_v27 = vpop.f32.mrf.mxu3 }
 0x960   :  { %v1295_v28 = vmul.f32 0.35355338, %v1235_v27 }
 0x962   :  { %v1313_v29 = vsel %vm101_vm1, %v1295_v28, -inf }
 0x963   :  { %1314 = vmax.xlane.f32.xlu1 %v1313_v29 }
 0x96f   :  { %v1287_v30 = vpop.f32.mrf.mxu2 }
 0x970   :  { %v1297_v31 = vmul.f32 0.35355338, %v1287_v30 }
 0x972   :  { %v1319_v32 = vsel %vm101_vm1, %v1297_v31, -inf }
 0x973   :  { %1320 = vmax.xlane.f32.xlu2 %v1319_v32 }
 0x97c   :  { %2181 = vrot.lane.b32.xlu1 %v2180_v33, %s2323_s25 }
 0x98b   :  { %2176 = vrot.lane.b32.xlu2 %v2175_v35, %s2323_s25 }
 0x995   :  { %v1306_v36 = vpop.xlane.xlu1 %1305 }
 0x996   :  { %v1324_v37 = vsub.f32 %v1292_v1, %v1306_v36  ;;  %v2101_v36 = vld [vmem:[%s2972_s3 + $0x20] sm:$0xff] }
 0x998   :  { %v1334_v39 = vmul.f32 1.442695, %v1324_v37  ;;  %v1309_v40 = vpop.xlane.xlu2 %1308 }
 0x999   :  { %v1325_v10 = vsub.f32 %v1293_v6, %v1309_v40 }
 0x99a   :  { %2255 = vpow2.f32 %v1334_v39 }
 0x99b   :  { %v1336_v17 = vmul.f32 1.442695, %v1325_v10 }
 0x99d   :  { %2257 = vpow2.f32 %v1336_v17  ;;  %v1303_v41 = vpop.xlane.xlu1 %1302 }
 0x99e   :  { %v1323_v12 = vsub.f32 %v1291_v8, %v1303_v41  ;;  %v1312_v13 = vpop.xlane.xlu0 %1311 }
 0x99f   :  { %v1326_v38 = vsub.f32 %v1294_v14, %v1312_v13 }
 0x9a0   :  { %v2256_v42 = vpop.eup %2255  ;;  %v1332_v44 = vmul.f32 1.442695, %v1323_v12 }
 0x9a1   :  { %v1338_v45 = vmul.f32 1.442695, %v1326_v38  ;;  %v1352_v46 = vsel %vm101_vm1, %v2256_v42, 0.0 }
 0x9a2   :  { %1353 = vadd.xlane.f32.xlu0 %v1352_v46  ;;  %v2103_v46 = vld [vmem:[%s2972_s3 + $0x30] sm:$0xff] }
 0x9a3   :  { %v2258_v4 = vpop.eup %2257  ;;  %2259 = vpow2.f32 %v1338_v45 }
 0x9a4   :  { %2261 = vpow2.f32 %v1332_v44  ;;  %v1355_v48 = vsel %vm101_vm1, %v2258_v4, 0.0 }
 0x9a6   :  { %1356 = vadd.xlane.f32.xlu1 %v1355_v48  ;;  %v2104_v48 = vld [vmem:[%s2972_s3 + $0x38] sm:$0xff] }
 0x9a9   :  { %v2260_v49 = vpop.eup %2259 }
 0x9aa   :  { %v2802_v15 = vpop.eup %2261  ;;  %v1358_v50 = vsel %vm101_vm1, %v2260_v49, 0.0 }
 0x9ab   :  { %1359 = vadd.xlane.f32.xlu0 %v1358_v50  ;;  %v1349_v54 = vsel %vm101_vm1, %v2802_v15, 0.0 }
 0x9ae   :  { %1350 = vadd.xlane.f32.xlu1 %v1349_v54 }
 0x9c2   :  { %v1348_v63 = vpop.xlane.xlu2 %1347 }
 0x9c7   :  { %2191 = vrot.lane.b32.xlu1 %v2190_v55, %s2323_s25  ;;  %v1318_v5 = vpop.xlane.xlu0 %1317  ;;  %v2102_v55 = vld [vmem:[%s2972_s3 + $0x28] sm:$0xff] }
 0x9c8   :  { %v1328_v56 = vsub.f32 %v1296_v25, %v1318_v5 }
 0x9ca   :  { %v1342_v57 = vmul.f32 1.442695, %v1328_v56 }
 0x9cc   :  { %2263 = vpow2.f32 %v1342_v57 }
 0x9d2   :  { %v2264_v58 = vpop.eup %2263 }
 0x9d3   :  { %v1364_v59 = vsel %vm101_vm1, %v2264_v58, 0.0 }
 0x9d4   :  { %1365 = vadd.xlane.f32.xlu0 %v1364_v59 }
 0x9d6   :  { %v1315_v60 = vpop.xlane.xlu1 %1314 }
 0x9d7   :  { %v1327_v61 = vsub.f32 %v1295_v28, %v1315_v60 }
 0x9d9   :  { %v1340_v62 = vmul.f32 1.442695, %v1327_v61 }
 0x9db   :  { %2265 = vpow2.f32 %v1340_v62 }
 0x9dc   :  { %2267 = vrcp.f32 %v1348_v63 }
 0x9e1   :  { %v2811_v0 = vpop.eup %2265 }
 0x9e2   :  { %v1361_v47 = vsel %vm101_vm1, %v2811_v0, 0.0  ;;  %v2268_v3 = vpop.eup %2267 }
 0x9e3   :  { %1362 = vadd.xlane.f32.xlu2 %v1361_v47  ;;  %v1378_v18 = vmul.f32 %v2268_v3, %v2787_v22 }
 0x9e6   :  { %v1321_v53 = vpop.xlane.xlu2 %1320 }
 0x9e7   :  { %v1329_v1 = vsub.f32 %v1297_v31, %v1321_v53 }
 0x9e9   :  { %v1344_v2 = vmul.f32 1.442695, %v1329_v1  ;;  %v2204_v1 = vld [vmem:[%s2973_s4 + $0x1] ss:$0 sm:$0xff] }
 0x9eb   :  { %2269 = vpow2.f32 %v1344_v2 }
 0x9ee   :  { %v2182_v6 = vpop.permute.xlu1 %2181  ;;  %v2177_v7 = vpop.permute.xlu2 %2176 }
 0x9ef   :  { %v2184_v8 = vunpack.i.h.bf16 %v2182_v6  ;;  %v2183_v9 = vunpack.i.l.bf16 %v2182_v6  ;;  %v2179_v14 = vunpack.i.h.bf16 %v2177_v7  ;;  %v2178_v16 = vunpack.i.l.bf16 %v2177_v7 }
 0x9f1   :  { %v2270_v19 = vpop.eup %2269  ;;  %1407 = vmatpush.msra.mxu3 %v2178_v16  ;;  %1459 = vmatpush.msra.mxu2 %v2179_v14 }
 0x9f2   :  { %2093 = vmatmul.msk.f32.vlgmr.msra.gmra.mxu3 %vm101_vm1, %v1378_v18  ;;  %v1367_v20 = vsel %vm101_vm1, %v2270_v19, 0.0 }
 0x9f3   :  { %1563 = vmatpush.msrb.mxu2 %v2184_v8  ;;  %1485 = vmatpush.msrb.mxu3 %v2183_v9 }
 0x9f4   :  { %1368 = vadd.xlane.f32.xlu0 %v1367_v20 }
 0xa08   :  { %2186 = vrot.lane.b32.xlu0 %v2185_v21, %s2323_s25 }
 0xa15   :  { %v1354_v23 = vpop.xlane.xlu0 %1353 }
 0xa16   :  { %2271 = vrcp.f32 %v1354_v23 }
 0xa19   :  { %v1357_v24 = vpop.xlane.xlu1 %1356 }
 0xa1a   :  { %2273 = vrcp.f32 %v1357_v24 }
 0xa1c   :  { %v2272_v22 = vpop.eup %2271 }
 0xa1d   :  { %v1380_v25 = vmul.f32 %v2272_v22, %v2256_v42 }
 0xa1e   :  { %v1360_v28 = vpop.xlane.xlu0 %1359 }
 0xa1f   :  { %2095 = vmatmul.msk.f32.vlgmr.msra.gmra.mxu2 %vm101_vm1, %v1380_v25  ;;  %2275 = vrcp.f32 %v1360_v28 }
 0xa20   :  { %v2274_v26 = vpop.eup %2273  ;;  %1663 = vmatpush.msra.mxu2 %v2103_v46 }
 0xa21   :  { %v1381_v27 = vmul.f32 %v2274_v26, %v2258_v4  ;;  %v1351_v29 = vpop.xlane.xlu1 %1350 }
 0xa23   :  { %2096 = vmatmul.msk.f32.vlgmr.msrb.gmra.mxu3 %vm101_vm1, %v1381_v27 }
 0xa25   :  { %v2276_v30 = vpop.eup %2275 }
 0xa26   :  { %v1382_v52 = vmul.f32 %v2276_v30, %v2260_v49 }
 0xa39   :  { %v2192_v31 = vpop.permute.xlu1 %2191 }
 0xa3a   :  { %v2193_v11 = vunpack.i.l.bf16 %v2192_v31  ;;  %v2194_v44 = vunpack.i.h.bf16 %v2192_v31 }
 0xa3c   :  { %1511 = vmatpush.msra.mxu0 %v2193_v11 }
 0xa3d   :  { %2097 = vmatmul.msk.f32.vlgmr.msra.gmra.mxu0 %vm101_vm1, %v1382_v52 }
 0xa3e   :  { %1617 = vmatpush.msrb.mxu0 %v2101_v36 }
 0xa40   :  { %1720 = vmatpush.msra.mxu0 %v2101_v36  ;;  %v2123_v36 = vld [vmem:[%s2974_s5 + $0x38] sm:$0xff] }
 0xa47   :  { %v1366_v32 = vpop.xlane.xlu0 %1365 }
 0xa48   :  { %2277 = vrcp.f32 %v1366_v32 }
 0xa49   :  { %2279 = vrcp.f32 %v1351_v29 }
 0xa4e   :  { %v2278_v33 = vpop.eup %2277 }
 0xa4f   :  { %v1384_v35 = vmul.f32 %v2278_v33, %v2264_v58  ;;  %v2280_v40 = vpop.eup %2279 }
 0xa50   :  { %v1379_v38 = vmul.f32 %v2280_v40, %v2802_v15  ;;  %v2120_v40 = vld [vmem:[%s2974_s5 + $0x20] sm:$0xff] }
 0xa51   :  { %2099 = vmatmul.msk.f32.vlgmr.msrb.gmra.mxu2 %vm101_vm1, %v1384_v35 }
 0xa52   :  { %1766 = vmatpush.msrb.mxu2 %v2103_v46 }
 0xa56   :  { %v1363_v10 = vpop.xlane.xlu2 %1362 }
 0xa67   :  { %v1369_v37 = vpop.xlane.xlu0 %1368 }
 0xa68   :  { %2281 = vrcp.f32 %v1369_v37  ;;  %v2122_v37 = vld [vmem:[%s2974_s5 + $0x30] sm:$0xff] }
 0xa69   :  { %2283 = vrcp.f32 %v1363_v10 }
 0xa6e   :  { %v2282_v17 = vpop.eup %2281 }
 0xa6f   :  { %v1385_v42 = vmul.f32 %v2282_v17, %v2270_v19  ;;  %v2284_v45 = vpop.eup %2283 }
 0xa70   :  { %v1383_v4 = vmul.f32 %v2284_v45, %v2811_v0  ;;  %v2139_v45 = vld [vmem:[%s2976_s7 + $0xe0] sm:$0xff] }
 0xa75   :  { %v1409_v39 = vpop.f32.mrf.mxu3 }
 0xa76   :  { %2105 = vmatmul.msk.f32.vlgmr.msrb.gmra.mxu0 %vm101_vm1, %v1409_v39  ;;  %v2121_v39 = vld [vmem:[%s2974_s5 + $0x28] sm:$0xff] }
 0xa77   :  { %1896 = vmatpush.msrb.mxu0 %v2123_v36 }
 0xa79   :  { %1897 = vmatpush.msrb.mxu0 %v2122_v37 }
 0xa7a   :  { %v2187_v41 = vpop.permute.xlu0 %2186 }
 0xa7b   :  { %v2189_v12 = vunpack.i.h.bf16 %v2187_v41  ;;  %v2188_v13 = vunpack.i.l.bf16 %v2187_v41  ;;  %1898 = vmatpush.msrb.mxu0 %v2121_v39 }
 0xa7d   :  { %1433 = vmatpush.msra.mxu1 %v2188_v13  ;;  %1589 = vmatpush.msra.mxu3 %v2189_v12  ;;  %v2142_v12 = vld [vmem:[%s2976_s7 + $0xf8] sm:$0xff]  ;;  %v2141_v13 = vld [vmem:[%s2976_s7 + $0xf0] sm:$0xff] }
 0xa7e   :  { %2094 = vmatmul.msk.f32.vlgmr.msra.gmra.mxu1 %vm101_vm1, %v1379_v38  ;;  %2100 = vmatmul.msk.f32.vlgmr.msra.gmra.mxu3 %vm101_vm1, %v1385_v42  ;;  %v2140_v38 = vld [vmem:[%s2976_s7 + $0xe8] sm:$0xff] }
 0xa7f   :  { %1537 = vmatpush.msrb.mxu1 %v2194_v44  ;;  %1686 = vmatpush.msrb.mxu3 %v2104_v48 }
 0xa80   :  { %1899 = vmatpush.msrb.mxu0 %v2120_v40 }
 0xa81   :  { %1789 = vmatpush.msra.mxu3 %v2104_v48  ;;  %1640 = vmatpush.msra.mxu1 %v2102_v55  ;;  %v2138_v48 = vld [vmem:[%s2976_s7 + $0xd8] sm:$0xff] }
 0xa86   :  { %2098 = vmatmul.msk.f32.vlgmr.msrb.gmra.mxu1 %vm101_vm1, %v1383_v4 }
 0xa87   :  { %1743 = vmatpush.msrb.mxu1 %v2102_v55 }
 0xaa2   :  { %v1461_v49 = vpop.f32.mrf.mxu2 }
 0xaa3   :  { %2107 = vmatmul.msk.f32.vlgmr.msra.gmra.mxu2 %vm101_vm1, %v1461_v49 }
 0xaa6   :  { %v1487_v15 = vpop.f32.mrf.mxu3 }
 0xaa7   :  { %2108 = vmatmul.msk.f32.vlgmr.msrb.gmra.mxu3 %vm101_vm1, %v1487_v15  ;;  %v2137_v15 = vld [vmem:[%s2976_s7 + $0xd0] sm:$0xff] }
 0xaba   :  { %v1513_v50 = vpop.f32.mrf.mxu0 }
 0xabb   :  { %2113 = vmatmul.msk.f32.vlgmr.msra.gmra.mxu0 %vm101_vm1, %v1513_v50 }
 0xad4   :  { %v1565_v54 = vpop.f32.mrf.mxu2 }
 0xad5   :  { %2115 = vmatmul.msk.f32.vlgmr.msrb.gmra.mxu2 %vm101_vm1, %v1565_v54  ;;  %v2136_v54 = vld [vmem:[%s2976_s7 + $0xc8] sm:$0xff] }
 0xaf3   :  { %v1619_v58 = vpop.f32.mrf.mxu0 }
 0xaf4   :  { %v1691_v61 = vsel %vm55_vm0, %v1619_v58, 0.0  ;;  %v2134_v58 = vld [vmem:[%s2976_s7 + $0xb8] sm:$0xff] }
 0xafb   :  { %v1435_v5 = vpop.f32.mrf.mxu1 }
 0xafc   :  { %2106 = vmatmul.msk.f32.vlgmr.msra.gmra.mxu1 %vm101_vm1, %v1435_v5  ;;  %v2135_v5 = vld [vmem:[%s2976_s7 + $0xc0] sm:$0xff] }
 0xafd   :  { %1931 = vmatpush.msra.mxu1 %v2142_v12 }
 0xaff   :  { %1932 = vmatpush.msra.mxu1 %v2141_v13 }
 0xb01   :  { %v1591_v56 = vpop.f32.mrf.mxu3  ;;  %1933 = vmatpush.msra.mxu1 %v2140_v38 }
 0xb02   :  { %2116 = vmatmul.msk.f32.vlgmr.msra.gmra.mxu3 %vm101_vm1, %v1591_v56 }
 0xb03   :  { %v1539_v57 = vpop.f32.mrf.mxu1  ;;  %1934 = vmatpush.msra.mxu1 %v2139_v45 }
 0xb04   :  { %2114 = vmatmul.msk.f32.vlgmr.msrb.gmra.mxu1 %vm101_vm1, %v1539_v57 }
 0xb05   :  { %1935 = vmatpush.msra.mxu1 %v2138_v48 }
 0xb07   :  { %1936 = vmatpush.msra.mxu1 %v2137_v15 }
 0xb09   :  { %1937 = vmatpush.msra.mxu1 %v2136_v54 }
 0xb0b   :  { %1938 = vmatpush.msra.mxu1 %v2135_v5 }
 0xb0d   :  { %1939 = vmatpush.msra.mxu1 %v2134_v58 }
 0xb26   :  { %v1665_v59 = vpop.f32.mrf.mxu2 }
 0xb27   :  { %v1694_v47 = vsel %vm55_vm0, %v1665_v59, 0.0 }
 0xb2a   :  { %v1688_v63 = vpop.f32.mrf.mxu3 }
 0xb2b   :  { %v1696_v2 = vsel %vm55_vm0, %v1688_v63, 0.0 }
 0xb38   :  { %v1722_v3 = vpop.f32.mrf.mxu0 }
 0xb39   :  { %v1794_v14 = vsel %vm55_vm0, %v1722_v3, 0.0 }
 0xb58   :  { %v1768_v7 = vpop.f32.mrf.mxu2 }
 0xb59   :  { %v1797_v20 = vsel %vm55_vm0, %v1768_v7, 0.0 }
 0xb79   :  { %v1642_v60 = vpop.f32.mrf.mxu1 }
 0xb7a   :  { %v1692_v62 = vsel %vm55_vm0, %v1642_v60, 0.0 }
 0xb7b   :  { %v1693_v0 = vadd.f32 %v1692_v62, %v1691_v61  ;;  %v2205_v61 = vld [vmem:[%s2978_s9 + $0x1] ss:$0 sm:$0xff]  ;;  %v2133_v62 = vld [vmem:[%s2976_s7 + $0xb0] sm:$0xff] }
 0xb7c   :  { %1940 = vmatpush.msra.mxu1 %v2133_v62  ;;  %v2210_v62 = vld [vmem:[%s2981_s12 + $0x1] ss:$0 sm:$0xff]  ;;  %s2326_s12 = smov 128  }
 0xb7d   :  { %v1695_v53 = vadd.f32 %v1694_v47, %v1693_v0 }
 0xb7f   :  { %v1697_v6 = vadd.f32 %v1696_v2, %v1695_v53  ;;  %v2206_v53 = vld [vmem:[%s2979_s10 + $0x1] ss:$0 sm:$0xff] }
 0xb81   :  { %v1745_v8 = vpop.f32.mrf.mxu1  ;;  %v1806_v9 = vadd.f32 %v2204_v1, %v1697_v6  ;;  %v2131_v6 = vld [vmem:[%s2976_s7 + $0xa0] sm:$0xff] }
 0xb82   :  { %v1795_v16 = vsel %vm55_vm0, %v1745_v8, 0.0 }
 0xb83   :  { %v1796_v18 = vadd.f32 %v1795_v16, %v1794_v14  ;;  %v1808_v19 = vadd.f32 %v1806_v9, %v2702_v34  ;;  %v2130_v9 = vld [vmem:[%s2976_s7 + $0x98] sm:$0xff] }
 0xb85   :  { %v1791_v21 = vpop.f32.mrf.mxu3  ;;  %v1798_v23 = vadd.f32 %v1797_v20, %v1796_v18  ;;  %v1810_v24 = vsel %vm55_vm0, %v1808_v19, 0.0 }
 0xb86   :  { %v1799_v22 = vsel %vm55_vm0, %v1791_v21, 0.0  ;;  %1811 = vadd.xlane.f32.xlu1 %v1810_v24  ;;  %v2129_v21 = vld [vmem:[%s2976_s7 + $0x90] sm:$0xff]  ;;  %v2127_v24 = vld [vmem:[%s2976_s7 + $0x80] sm:$0xff] }
 0xb87   :  { %v1800_v25 = vadd.f32 %v1799_v22, %v1798_v23  ;;  %v2128_v23 = vld [vmem:[%s2976_s7 + $0x88] sm:$0xff]  ;;  %v2207_v22 = vld [vmem:[%s2975_s6 + $0x1] ss:$0 sm:$0xff] }
 0xb89   :  { %v1807_v26 = vadd.f32 %v2204_v1, %v1800_v25  ;;  %v2132_v1 = vld [vmem:[%s2976_s7 + $0xa8] sm:$0xff] }
 0xb8a   :  { %1941 = vmatpush.msra.mxu1 %v2132_v1 }
 0xb8b   :  { %v1809_v27 = vadd.f32 %v1807_v26, %v2707_v43 }
 0xb8c   :  { %1942 = vmatpush.msra.mxu1 %v2131_v6 }
 0xb8d   :  { %v1813_v28 = vsel %vm55_vm0, %v1809_v27, 0.0 }
 0xb8e   :  { %1814 = vadd.xlane.f32.xlu0 %v1813_v28  ;;  %1943 = vmatpush.msra.mxu1 %v2130_v9 }
 0xb90   :  { %1944 = vmatpush.msra.mxu1 %v2129_v21 }
 0xb92   :  { %1945 = vmatpush.msra.mxu1 %v2128_v23 }
 0xb94   :  { %1946 = vmatpush.msra.mxu1 %v2127_v24 }
 0xbf9   :  { %v1812_v29 = vpop.xlane.xlu1 %1811 }
 0xbfa   :  { %v1816_v30 = vmul.f32 %v1812_v29, %v2586_v51 }
 0xbfc   :  { %v1818_v34 = vsub.f32 %v1808_v19, %v1816_v30 }
 0xbfe   :  { %v1820_v31 = vmul.f32 %v1818_v34, %v1818_v34 }
 0xc00   :  { %v1822_v11 = vsel %vm55_vm0, %v1820_v31, 0.0 }
 0xc01   :  { %v1815_v52 = vpop.xlane.xlu0 %1814  ;;  %1823 = vadd.xlane.f32.xlu2 %v1822_v11 }
 0xc02   :  { %v1817_v32 = vmul.f32 %v1815_v52, %v2586_v51 }
 0xc04   :  { %v2868_v33 = vsub.f32 %v1809_v27, %v1817_v32 }
 0xc06   :  { %v1821_v35 = vmul.f32 %v2868_v33, %v2868_v33 }
 0xc08   :  { %v1825_v43 = vsel %vm55_vm0, %v1821_v35, 0.0 }
 0xc09   :  { %1826 = vadd.xlane.f32.xlu2 %v1825_v43 }
 0xc74   :  { %v1824_v10 = vpop.xlane.xlu2 %1823 }
 0xc75   :  { %v1828_v17 = vmul.f32 %v1824_v10, %v2586_v51 }
 0xc77   :  { %v1830_v41 = vadd.f32 1e-05, %v1828_v17 }
 0xc79   :  { %2285 = vrsqrt.f32 %v1830_v41  ;;  %vm1838_vm1 = vweird.f32 %v1830_v41 }
 0xc7c   :  { %v1827_v42 = vpop.xlane.xlu2 %1826 }
 0xc7d   :  { %v1829_v44 = vmul.f32 %v1827_v42, %v2586_v51 }
 0xc7f   :  { %v2286_v46 = vpop.eup %2285  ;;  %v1831_v4 = vadd.f32 1e-05, %v1829_v44 }
 0xc80   :  { %v1833_v49 = vmul.f32 %v2286_v46, %v1830_v41  ;;  %vm1839_vm15 = vweird.f32 %v2286_v46 }
 0xc81   :  { %2287 = vrsqrt.f32 %v1831_v4  ;;  %vm1840_vm2 = vmor %vm1838_vm1, %vm1839_vm15  ;;  %vm1848_vm4 = vweird.f32 %v1831_v4 }
 0xc82   :  { %v1834_v50 = vmul.f32 %v2286_v46, %v1833_v49 }
 0xc84   :  { %v1835_v55 = vmul.f32 0.5, %v1834_v50 }
 0xc86   :  { %v1836_v56 = vsub.f32 1.5, %v1835_v55 }
 0xc87   :  { %v2288_v57 = vpop.eup %2287 }
 0xc88   :  { %v1837_v59 = vmul.f32 %v2286_v46, %v1836_v56  ;;  %v1843_v60 = vmul.f32 %v2288_v57, %v1831_v4  ;;  %vm1849_vm3 = vweird.f32 %v2288_v57 }
 0xc89   :  { %vm1850_vm5 = vmor %vm1848_vm4, %vm1849_vm3 }
 0xc8a   :  { %v1841_v63 = vsel %vm1840_vm2, %v2286_v46, %v1837_v59  ;;  %v1844_v0 = vmul.f32 %v2288_v57, %v1843_v60  ;;  %v2209_v59 = vld [vmem:[%s2980_s11 + $0x1] ss:$0 sm:$0xff]  ;;  %s2325_s11 = smov [#allocation2]  }
 0xc8b   :  { %v1852_v47 = vmul.f32 %v1841_v63, %v1818_v34  ;;  %v2208_v34 = vld [vmem:[%s2977_s8 + $0x1] ss:$0 sm:$0xff]  ;;  %s2020_s18 = sshll.u32 %s2325_s11, 4  ;;  %s2021_s18 = int_to_ptr.vmem [resolvable:$true] %s2020_s18 }
 0xc8c   :  { %v1845_v2 = vmul.f32 0.5, %v1844_v0 }
 0xc8d   :  { %v1859_v3 = vmul.f32 %v2205_v61, %v1852_v47 }
 0xc8e   :  { %v1846_v7 = vsub.f32 1.5, %v1845_v2 }
 0xc8f   :  { %v1866_v8 = vadd.f32 %v2206_v53, %v1859_v3 }
 0xc90   :  { %v1847_v14 = vmul.f32 %v2288_v57, %v1846_v7 }
 0xc91   :  { %2125 = vmatmul.msk.f32.vlgmr.msrb.gmra.mxu0 %vm55_vm0, %v1866_v8 }
 0xc92   :  { %v1851_v16 = vsel %vm1850_vm5, %v2288_v57, %v1847_v14 }
 0xc93   :  { %v1853_v18 = vmul.f32 %v1851_v16, %v2868_v33 }
 0xc95   :  { %v1860_v19 = vmul.f32 %v2205_v61, %v1853_v18 }
 0xc97   :  { %v1867_v20 = vadd.f32 %v2206_v53, %v1860_v19 }
 0xc99   :  { %2126 = vmatmul.msk.f32.gmra.mxu0 %vm55_vm0, %v1867_v20 }
 0xd0e   :  { %v1901_v25 = vpop.f32.mrf.mxu0 }
 0xd0f   :  { %v1902_v26 = vadd.f32 %v2207_v22, %v1901_v25 }
 0xd11   :  { %v1907_v27 = vmax.f32 %v1902_v26, 0.0 }
 0xd13   :  { %1947 = vmatmul.f32.vlgmr.msra.gmra.mxu1 %v1907_v27 }
 0xd16   :  { %v1904_v28 = vpop.f32.mrf.mxu0 }
 0xd17   :  { %v1905_v29 = vadd.f32 %v2207_v22, %v1904_v28 }
 0xd19   :  { %v1908_v30 = vmax.f32 %v1905_v29, 0.0 }
 0xd1b   :  { %1950 = vmatmul.f32.gmra.mxu1 %v1908_v30 }
 0xd90   :  { %v1948_v31 = vpop.f32.mrf.mxu1 }
 0xd91   :  { %v1949_v11 = vadd.f32 %v2208_v34, %v1948_v31 }
 0xd93   :  { %v1954_v52 = vadd.f32 %v1949_v11, %v1866_v8 }
 0xd95   :  { %v1956_v32 = vsel %vm55_vm0, %v1954_v52, 0.0 }
 0xd96   :  { %1957 = vadd.xlane.f32.xlu2 %v1956_v32 }
 0xd98   :  { %v1951_v33 = vpop.f32.mrf.mxu1 }
 0xd99   :  { %v1952_v35 = vadd.f32 %v2208_v34, %v1951_v33 }
 0xd9b   :  { %v1955_v43 = vadd.f32 %v1952_v35, %v1867_v20 }
 0xd9d   :  { %v1959_v36 = vsel %vm55_vm0, %v1955_v43, 0.0 }
 0xd9e   :  { %1960 = vadd.xlane.f32.xlu1 %v1959_v36 }
 0xe09   :  { %v1958_v37 = vpop.xlane.xlu2 %1957 }
 0xe0a   :  { %v1962_v39 = vmul.f32 %v1958_v37, %v2586_v51 }
 0xe0c   :  { %v1964_v40 = vsub.f32 %v1954_v52, %v1962_v39 }
 0xe0e   :  { %v1966_v10 = vmul.f32 %v1964_v40, %v1964_v40 }
 0xe10   :  { %v1968_v17 = vsel %vm55_vm0, %v1966_v10, 0.0 }
 0xe11   :  { %v1961_v41 = vpop.xlane.xlu1 %1960  ;;  %1969 = vadd.xlane.f32.xlu0 %v1968_v17 }
 0xe12   :  { %v1963_v12 = vmul.f32 %v1961_v41, %v2586_v51 }
 0xe14   :  { %v1965_v13 = vsub.f32 %v1955_v43, %v1963_v12 }
 0xe16   :  { %v1967_v38 = vmul.f32 %v1965_v13, %v1965_v13 }
 0xe18   :  { %v1971_v42 = vsel %vm55_vm0, %v1967_v38, 0.0 }
 0xe19   :  { %1972 = vadd.xlane.f32.xlu2 %v1971_v42 }
 0xe84   :  { %v1970_v44 = vpop.xlane.xlu0 %1969 }
 0xe85   :  { %v1974_v45 = vmul.f32 %v1970_v44, %v2586_v51 }
 0xe87   :  { %v1976_v46 = vadd.f32 1e-05, %v1974_v45 }
 0xe89   :  { %2289 = vrsqrt.f32 %v1976_v46  ;;  %vm1984_vm7 = vweird.f32 %v1976_v46 }
 0xe8c   :  { %v1973_v4 = vpop.xlane.xlu2 %1972 }
 0xe8d   :  { %v1975_v48 = vmul.f32 %v1973_v4, %v2586_v51 }
 0xe8f   :  { %v2290_v49 = vpop.eup %2289  ;;  %v1977_v15 = vadd.f32 1e-05, %v1975_v48 }
 0xe90   :  { %v1979_v50 = vmul.f32 %v2290_v49, %v1976_v46  ;;  %vm1985_vm6 = vweird.f32 %v2290_v49 }
 0xe91   :  { %2291 = vrsqrt.f32 %v1977_v15  ;;  %vm1986_vm8 = vmor %vm1984_vm7, %vm1985_vm6  ;;  %vm1994_vm10 = vweird.f32 %v1977_v15 }
 0xe92   :  { %v1980_v54 = vmul.f32 %v2290_v49, %v1979_v50 }
 0xe94   :  { %v1981_v55 = vmul.f32 0.5, %v1980_v54 }
 0xe96   :  { %v1982_v5 = vsub.f32 1.5, %v1981_v55 }
 0xe97   :  { %v2292_v56 = vpop.eup %2291 }
 0xe98   :  { %v1983_v57 = vmul.f32 %v2290_v49, %v1982_v5  ;;  %v1989_v58 = vmul.f32 %v2292_v56, %v1977_v15  ;;  %vm1995_vm9 = vweird.f32 %v2292_v56 }
 0xe99   :  { %vm1996_vm11 = vmor %vm1994_vm10, %vm1995_vm9 }
 0xe9a   :  { %v1987_v60 = vsel %vm1986_vm8, %v2290_v49, %v1983_v57  ;;  %v1990_v61 = vmul.f32 %v2292_v56, %v1989_v58 }
 0xe9b   :  { %v1998_v51 = vmul.f32 %v1987_v60, %v1964_v40 }
 0xe9c   :  { %v1991_v63 = vmul.f32 0.5, %v1990_v61 }
 0xe9d   :  { %v2005_v0 = vmul.f32 %v2209_v59, %v1998_v51 }
 0xe9e   :  { %v1992_v47 = vsub.f32 1.5, %v1991_v63 }
 0xe9f   :  { %v2012_v53 = vadd.f32 %v2210_v62, %v2005_v0 }
 0xea0   :  { %v1993_v1 = vmul.f32 %v2292_v56, %v1992_v47 }
 0xea1   :  { %2014 = vst.msk [vmem:[#allocation2] sm:$0xff] %vm55_vm0, %v2012_v53 }
 0xea2   :  { %v1997_v2 = vsel %vm1996_vm11, %v2292_v56, %v1993_v1 }
 0xea3   :  { %v1999_v3 = vmul.f32 %v1997_v2, %v1965_v13 }
 0xea5   :  { %v2006_v6 = vmul.f32 %v2209_v59, %v1999_v3 }
 0xea7   :  { %v2013_v7 = vadd.f32 %v2210_v62, %v2006_v6 }
 0xea9   :  { %2015 = vst.msk [vmem:[#allocation2 + $0x8] sm:$0xff] %vm55_vm0, %v2013_v7 }
 0xeaa   :  { %2028 = dma.vmem_to_hbm [thread:$0]  %s2021_s18, 256, %s2023_s21, [#allocation3], %s2326_s12, %s2326_s12, %s2327_s26  }
 0xeab   :  { %2317 = dma.done.wait [#allocation3], 256  }
 0xeac   :  { %2318 = vsyncadd [#allocation3], 4294967040 }
 0xead   :  { %2033 = vsyncpa [#allocation3], 1 }

</bundles_post_ra>
